<compile_context>
chip_gen: v7x
topology: tpu7x:2x2x1
jax: 0.10.0
libtpu: 0.0.40
codegen_flags: <defaults>
</compile_context>

<pallas_src>
import functools

import jax
import jax.numpy as jnp
from jax import lax
from jax.experimental import pallas as pl
from jax.experimental.pallas import tpu as pltpu

HIDDEN = 128


def _round_up(n, m):
    return ((n + m - 1) // m) * m


def _chemical_rnn_chunk_kernel(
    xproj_ref,     # (TS, 128)   x_t @ W1_ih^T for this chunk (precomputed)
    hx1_init_ref,  # (1, 128)    initial hidden state 1 (constant block)
    hx2_init_ref,  # (1, 128)    initial hidden state 2 (constant block)
    w1hh_t_ref,    # (128, 128)  W1_hh^T  (VMEM-resident across all chunks)
    w2ih_t_ref,    # (128, 128)  W2_ih^T
    w2hh_t_ref,    # (128, 128)  W2_hh^T
    h1_ref,        # (TS, 128)   per-step hx1_new for this chunk
    h2_ref,        # (TS, 128)   per-step hx2_new for this chunk
    hx1_s,         # VMEM scratch (1, 128) f32 — hidden state carried across chunks
    hx2_s,         # VMEM scratch (1, 128) f32
    *, ts,
):
    c = pl.program_id(0)

    @pl.when(c == 0)
    def _():
        hx1_s[...] = hx1_init_ref[...].astype(jnp.float32)
        hx2_s[...] = hx2_init_ref[...].astype(jnp.float32)

    # Weights and chunk input loaded once per chunk.
    w1hh = w1hh_t_ref[...]
    w2ih = w2ih_t_ref[...]
    w2hh = w2hh_t_ref[...]
    xp = xproj_ref[...]                      # (TS, 128)

    # Loop-carried registers; scratch is only read once here ...
    h1 = hx1_s[...]
    h2 = hx2_s[...]

    # Fully unrolled (ts is a Python int): static slices / static row stores,
    # states stay in vregs across steps. Output stores are off the serial
    # dependency chain (chain runs through h1/h2 values only).
    for t in range(ts):
        h1 = jnp.tanh(
            xp[t:t + 1, :]
            + jnp.dot(h1, w1hh, preferred_element_type=jnp.float32)
        )
        h2 = jnp.tanh(
            jnp.dot(h1, w2ih, preferred_element_type=jnp.float32)
            + jnp.dot(h2, w2hh, preferred_element_type=jnp.float32)
        )
        h1_ref[pl.ds(t, 1), :] = h1
        h2_ref[pl.ds(t, 1), :] = h2

    # ... and written once here (carry to the next chunk).
    hx1_s[...] = h1
    hx2_s[...] = h2


def prepare_params(params):
    """One-time weight prep: transposes only (done once, not per call)."""
    return {
        "w1ih_t": jnp.asarray(params["w1_ih"].T, jnp.float32),  # (dim_in, 128)
        "w1hh_t": jnp.asarray(params["w1_hh"].T, jnp.float32),  # (128, 128)
        "w2ih_t": jnp.asarray(params["w2_ih"].T, jnp.float32),  # (128, 128)
        "w2hh_t": jnp.asarray(params["w2_hh"].T, jnp.float32),  # (128, 128)
        "wout_t": jnp.asarray(params["w_out"].T, jnp.float32),  # (128, dim_out)
    }


@jax.jit
def chemical_rnn_sequence(x_seq, hx1, hx2, prepared):
    """Run T sequential forward steps; serial recurrence in one pallas_call.

    Args:
      x_seq: (T, B, dim_in) float32, B must be 1 (module's hx1 is (1, 128))
      hx1:   (B, 128) float32 initial hidden state 1
      hx2:   (B, 128) float32 initial hidden state 2
      prepared: output of prepare_params

    Returns:
      h1_seq (T, B, 128), h2_seq (T, B, 128), out_seq (T, B, dim_out)
    """
    T, B, dim_in = x_seq.shape
    assert B == 1, "module carries hx1 of shape (1, 128); batch must be 1"

    # Hoisted input projection (no recurrence): one dense XLA matmul, time on
    # the sublane axis (T, 128).
    xproj = jnp.dot(
        x_seq.reshape(T * B, dim_in), prepared["w1ih_t"],
        precision=lax.Precision.HIGHEST,
    )

    # Chunk the time axis: TS timesteps per grid step, TS multiple of 8.
    ts = min(64, _round_up(T, 8))
    t_pad = _round_up(T, ts)
    if t_pad != T:
        xproj = jnp.pad(xproj, ((0, t_pad - T), (0, 0)))

    kernel = functools.partial(_chemical_rnn_chunk_kernel, ts=ts)

    h1_seq, h2_seq = pl.pallas_call(
        kernel,
        grid=(t_pad // ts,),
        in_specs=[
            pl.BlockSpec((ts, HIDDEN), lambda c: (c, 0)),       # xproj chunk
            pl.BlockSpec((1, HIDDEN), lambda c: (0, 0)),        # hx1 init
            pl.BlockSpec((1, HIDDEN), lambda c: (0, 0)),        # hx2 init
            pl.BlockSpec((HIDDEN, HIDDEN), lambda c: (0, 0)),   # W1_hh^T
            pl.BlockSpec((HIDDEN, HIDDEN), lambda c: (0, 0)),   # W2_ih^T
            pl.BlockSpec((HIDDEN, HIDDEN), lambda c: (0, 0)),   # W2_hh^T
        ],
        out_specs=[
            pl.BlockSpec((ts, HIDDEN), lambda c: (c, 0)),
            pl.BlockSpec((ts, HIDDEN), lambda c: (c, 0)),
        ],
        out_shape=[
            jax.ShapeDtypeStruct((t_pad, HIDDEN), jnp.float32),
            jax.ShapeDtypeStruct((t_pad, HIDDEN), jnp.float32),
        ],
        scratch_shapes=[
            pltpu.VMEM((1, HIDDEN), jnp.float32),
            pltpu.VMEM((1, HIDDEN), jnp.float32),
        ],
        compiler_params=pltpu.CompilerParams(
            dimension_semantics=("arbitrary",),   # time axis is serial
        ),
    )(xproj, hx1, hx2,
      prepared["w1hh_t"], prepared["w2ih_t"], prepared["w2hh_t"])

    h1_seq = h1_seq[:T].reshape(T, B, HIDDEN)
    h2_seq = h2_seq[:T].reshape(T, B, HIDDEN)

    # Hoisted output projection (dual of the xproj hoist): recurrence-free, so
    # it does not belong on the serial critical path inside the kernel.
    out_seq = jnp.dot(
        h2_seq.reshape(T * B, HIDDEN), prepared["wout_t"],
        precision=lax.Precision.HIGHEST,
    ).reshape(T, B, -1)

    return h1_seq, h2_seq, out_seq


def chemical_rnn_forward(x, hx1, hx2, prepared):
    """Single-step forward matching the PyTorch module's return signature.

    TODO(synk): per-step Python dispatch (~µs) dominates this ~100 KFLOP step;
    prefer chemical_rnn_sequence over calling this in a Python loop.
    """
    h1_seq, h2_seq, out_seq = chemical_rnn_sequence(x[None], hx1, hx2, prepared)
    hx1_new, hx2_new, out = h1_seq[0], h2_seq[0], out_seq[0]
    return (x, hx1, hx1_new, hx2, hx2_new), out


def init_params(key, dim_in, dim_out):
    """PyTorch-shaped parameters with U(-1/sqrt(fan), 1/sqrt(fan)) init."""
    ks = jax.random.split(key, 5)
    bound = 1.0 / jnp.sqrt(jnp.float32(HIDDEN))

    def u(k, shape, b):
        return jax.random.uniform(k, shape, jnp.float32, -b, b)

    return {
        "w1_ih": u(ks[0], (HIDDEN, dim_in), bound),   # RNN_forward1.weight_ih
        "w1_hh": u(ks[1], (HIDDEN, HIDDEN), bound),   # RNN_forward1.weight_hh
        "w2_ih": u(ks[2], (HIDDEN, HIDDEN), bound),   # RNN_forward2.weight_ih
        "w2_hh": u(ks[3], (HIDDEN, HIDDEN), bound),   # RNN_forward2.weight_hh
        "w_out": u(ks[4], (dim_out, HIDDEN), bound),  # forward1.weight
    }


def reference_sequence(x_seq, hx1, hx2, params):
    """Pure-JAX scan reference (exact per-step PyTorch math)."""
    hi = lax.Precision.HIGHEST

    def step(carry, x):
        h1p, h2p = carry
        h1 = jnp.tanh(
            jnp.dot(x, params["w1_ih"].T, precision=hi)
            + jnp.dot(h1p, params["w1_hh"].T, precision=hi)
        )
        h2 = jnp.tanh(
            jnp.dot(h1, params["w2_ih"].T, precision=hi)
            + jnp.dot(h2p, params["w2_hh"].T, precision=hi)
        )
        out = jnp.dot(h2, params["w_out"].T, precision=hi)
        return (h1, h2), (h1, h2, out)

    _, (h1s, h2s, outs) = jax.lax.scan(step, (hx1, hx2), x_seq)
    return h1s, h2s, outs


if __name__ == "__main__":
    key = jax.random.PRNGKey(0)
    dim_in, dim_out = 8, 4
    batch = 1   # module's hx1 is (1, 128); forward asserts batch == 1
    T = 8       # sequence length for the fused kernel

    k_params, k_x = jax.random.split(key, 2)
    params = init_params(k_params, dim_in, dim_out)
    prepared = prepare_params(params)

    x_seq = jax.random.normal(k_x, (T, batch, dim_in), jnp.float32)
    hx1 = jnp.zeros((batch, HIDDEN), jnp.float32)  # module resets hidden to zeros
    hx2 = jnp.zeros((batch, HIDDEN), jnp.float32)

    # --- Time-chunked kernel (whole sequence in one grid step here) ---
    h1_seq, h2_seq, out_seq = jax.block_until_ready(
        chemical_rnn_sequence(x_seq, hx1, hx2, prepared)
    )

    h1_ref, h2_ref, out_ref = reference_sequence(x_seq, hx1, hx2, params)
    assert jnp.allclose(h1_seq, h1_ref, atol=1e-4, rtol=1e-4), "hx1 sequence mismatch"
    assert jnp.allclose(h2_seq, h2_ref, atol=1e-4, rtol=1e-4), "hx2 sequence mismatch"
    assert jnp.allclose(out_seq, out_ref, atol=1e-4, rtol=1e-4), "output sequence mismatch"
    assert out_seq.shape == (T, batch, dim_out)

    # --- Single-step API matching the PyTorch module's forward() signature ---
    x0 = x_seq[0]
    (x_r, hx1_prev, hx1_new, hx2_prev, hx2_new), out0 = jax.block_until_ready(
        chemical_rnn_forward(x0, hx1, hx2, prepared)
    )
    assert jnp.allclose(hx1_new, h1_ref[0], atol=1e-4, rtol=1e-4), "step hx1 mismatch"
    assert jnp.allclose(hx2_new, h2_ref[0], atol=1e-4, rtol=1e-4), "step hx2 mismatch"
    assert jnp.allclose(out0, out_ref[0], atol=1e-4, rtol=1e-4), "step output mismatch"
    assert jnp.array_equal(hx1_prev, hx1) and jnp.array_equal(hx2_prev, hx2)
    assert out0.shape == (batch, dim_out)

    print("KERNEL_OK")
</pallas_src>

<mosaic_0001>
module attributes {stable_mosaic.version = 11 : i64} {
  func.func @_chemical_rnn_chunk_kernel(%arg0: i32, %arg1: memref<8x128xf32, #tpu.memory_space<vmem>>, %arg2: memref<1x128xf32, #tpu.memory_space<vmem>>, %arg3: memref<1x128xf32, #tpu.memory_space<vmem>>, %arg4: memref<128x128xf32, #tpu.memory_space<vmem>>, %arg5: memref<128x128xf32, #tpu.memory_space<vmem>>, %arg6: memref<128x128xf32, #tpu.memory_space<vmem>>, %arg7: memref<8x128xf32, #tpu.memory_space<vmem>>, %arg8: memref<8x128xf32, #tpu.memory_space<vmem>>, %arg9: memref<1x128xf32, #tpu.memory_space<vmem>>, %arg10: memref<1x128xf32, #tpu.memory_space<vmem>>) attributes {dimension_semantics = [#tpu.dimension_semantics<arbitrary>], iteration_bounds = array<i64: 1>, scalar_prefetch = 0 : i64, scratch_operands = 2 : i64, tpu.core_type = #tpu.core_type<tc>, window_params = [{transform_indices = @transform_0, window_bounds = array<i64: 8, 128>}, {pipeline_mode = #tpu.pipeline_mode<synchronous>, transform_indices = @transform_1, window_bounds = array<i64: 1, 128>}, {pipeline_mode = #tpu.pipeline_mode<synchronous>, transform_indices = @transform_2, window_bounds = array<i64: 1, 128>}, {pipeline_mode = #tpu.pipeline_mode<synchronous>, transform_indices = @transform_3, window_bounds = array<i64: 128, 128>}, {pipeline_mode = #tpu.pipeline_mode<synchronous>, transform_indices = @transform_4, window_bounds = array<i64: 128, 128>}, {pipeline_mode = #tpu.pipeline_mode<synchronous>, transform_indices = @transform_5, window_bounds = array<i64: 128, 128>}, {transform_indices = @transform_6, window_bounds = array<i64: 8, 128>}, {transform_indices = @transform_7, window_bounds = array<i64: 8, 128>}]} {
    %c0_i32 = arith.constant 0 : i32
    %0 = arith.cmpi eq, %arg0, %c0_i32 : i32
    %1 = arith.extui %0 : i1 to i32
    %c0_i32_0 = arith.constant 0 : i32
    %2 = arith.cmpi ne, %1, %c0_i32_0 : i32
    scf.if %2 {
      %c0_64 = arith.constant 0 : index
      %c0_65 = arith.constant 0 : index
      %91 = vector.load %arg2[%c0_64, %c0_65] : memref<1x128xf32, #tpu.memory_space<vmem>>, vector<1x128xf32>
      %c0_66 = arith.constant 0 : index
      %c0_67 = arith.constant 0 : index
      %92 = vector.load %arg9[%c0_66, %c0_67] : memref<1x128xf32, #tpu.memory_space<vmem>>, vector<1x128xf32>
      tpu.vector_store %arg9[%c0_66, %c0_67], %91 {strides = array<i32>} : memref<1x128xf32, #tpu.memory_space<vmem>>, vector<1x128xf32>,
      %c0_68 = arith.constant 0 : index
      %c0_69 = arith.constant 0 : index
      %93 = vector.load %arg3[%c0_68, %c0_69] : memref<1x128xf32, #tpu.memory_space<vmem>>, vector<1x128xf32>
      %c0_70 = arith.constant 0 : index
      %c0_71 = arith.constant 0 : index
      %94 = vector.load %arg10[%c0_70, %c0_71] : memref<1x128xf32, #tpu.memory_space<vmem>>, vector<1x128xf32>
      tpu.vector_store %arg10[%c0_70, %c0_71], %93 {strides = array<i32>} : memref<1x128xf32, #tpu.memory_space<vmem>>, vector<1x128xf32>,
    } else {
    }
    %c0 = arith.constant 0 : index
    %c0_1 = arith.constant 0 : index
    %3 = vector.load %arg4[%c0, %c0_1] : memref<128x128xf32, #tpu.memory_space<vmem>>, vector<128x128xf32>
    %c0_2 = arith.constant 0 : index
    %c0_3 = arith.constant 0 : index
    %4 = vector.load %arg5[%c0_2, %c0_3] : memref<128x128xf32, #tpu.memory_space<vmem>>, vector<128x128xf32>
    %c0_4 = arith.constant 0 : index
    %c0_5 = arith.constant 0 : index
    %5 = vector.load %arg6[%c0_4, %c0_5] : memref<128x128xf32, #tpu.memory_space<vmem>>, vector<128x128xf32>
    %c0_6 = arith.constant 0 : index
    %c0_7 = arith.constant 0 : index
    %6 = vector.load %arg1[%c0_6, %c0_7] : memref<8x128xf32, #tpu.memory_space<vmem>>, vector<8x128xf32>
    %c0_8 = arith.constant 0 : index
    %c0_9 = arith.constant 0 : index
    %7 = vector.load %arg9[%c0_8, %c0_9] : memref<1x128xf32, #tpu.memory_space<vmem>>, vector<1x128xf32>
    %c0_10 = arith.constant 0 : index
    %c0_11 = arith.constant 0 : index
    %8 = vector.load %arg10[%c0_10, %c0_11] : memref<1x128xf32, #tpu.memory_space<vmem>>, vector<1x128xf32>
    %9 = vector.extract_strided_slice %6 {offsets = [0, 0], sizes = [1, 128], strides = [1, 1]} : vector<8x128xf32> to vector<1x128xf32>
    %cst = arith.constant dense<0.000000e+00> : vector<1x128xf32>
    %10 = tpu.matmul %7, %3, %cst {dimension_numbers = #tpu.dot_dimension_numbers<[1], [0], [0], [1], [0, 0, 1, 1], [], []>} : vector<1x128xf32>, vector<128x128xf32>, vector<1x128xf32> -> vector<1x128xf32>
    %11 = arith.addf %9, %10 : vector<1x128xf32>
    %12 = math.tanh %11 : vector<1x128xf32>
    %cst_12 = arith.constant dense<0.000000e+00> : vector<1x128xf32>
    %13 = tpu.matmul %12, %4, %cst_12 {dimension_numbers = #tpu.dot_dimension_numbers<[1], [0], [0], [1], [0, 0, 1, 1], [], []>} : vector<1x128xf32>, vector<128x128xf32>, vector<1x128xf32> -> vector<1x128xf32>
    %cst_13 = arith.constant dense<0.000000e+00> : vector<1x128xf32>
    %14 = tpu.matmul %8, %5, %cst_13 {dimension_numbers = #tpu.dot_dimension_numbers<[1], [0], [0], [1], [0, 0, 1, 1], [], []>} : vector<1x128xf32>, vector<128x128xf32>, vector<1x128xf32> -> vector<1x128xf32>
    %15 = arith.addf %13, %14 : vector<1x128xf32>
    %16 = math.tanh %15 : vector<1x128xf32>
    %c0_14 = arith.constant 0 : index
    %c0_15 = arith.constant 0 : index
    %17 = vector.load %arg7[%c0_14, %c0_15] : memref<8x128xf32, #tpu.memory_space<vmem>>, vector<1x128xf32>
    tpu.vector_store %arg7[%c0_14, %c0_15], %12 {strides = array<i32>} : memref<8x128xf32, #tpu.memory_space<vmem>>, vector<1x128xf32>,
    %c0_16 = arith.constant 0 : index
    %c0_17 = arith.constant 0 : index
    %18 = vector.load %arg8[%c0_16, %c0_17] : memref<8x128xf32, #tpu.memory_space<vmem>>, vector<1x128xf32>
    tpu.vector_store %arg8[%c0_16, %c0_17], %16 {strides = array<i32>} : memref<8x128xf32, #tpu.memory_space<vmem>>, vector<1x128xf32>,
    %19 = vector.extract_strided_slice %6 {offsets = [1, 0], sizes = [1, 128], strides = [1, 1]} : vector<8x128xf32> to vector<1x128xf32>
    %cst_18 = arith.constant dense<0.000000e+00> : vector<1x128xf32>
    %20 = tpu.matmul %12, %3, %cst_18 {dimension_numbers = #tpu.dot_dimension_numbers<[1], [0], [0], [1], [0, 0, 1, 1], [], []>} : vector<1x128xf32>, vector<128x128xf32>, vector<1x128xf32> -> vector<1x128xf32>
    %21 = arith.addf %19, %20 : vector<1x128xf32>
    %22 = math.tanh %21 : vector<1x128xf32>
    %cst_19 = arith.constant dense<0.000000e+00> : vector<1x128xf32>
    %23 = tpu.matmul %22, %4, %cst_19 {dimension_numbers = #tpu.dot_dimension_numbers<[1], [0], [0], [1], [0, 0, 1, 1], [], []>} : vector<1x128xf32>, vector<128x128xf32>, vector<1x128xf32> -> vector<1x128xf32>
    %cst_20 = arith.constant dense<0.000000e+00> : vector<1x128xf32>
    %24 = tpu.matmul %16, %5, %cst_20 {dimension_numbers = #tpu.dot_dimension_numbers<[1], [0], [0], [1], [0, 0, 1, 1], [], []>} : vector<1x128xf32>, vector<128x128xf32>, vector<1x128xf32> -> vector<1x128xf32>
    %25 = arith.addf %23, %24 : vector<1x128xf32>
    %26 = math.tanh %25 : vector<1x128xf32>
    %c1 = arith.constant 1 : index
    %c0_21 = arith.constant 0 : index
    %27 = vector.load %arg7[%c1, %c0_21] : memref<8x128xf32, #tpu.memory_space<vmem>>, vector<1x128xf32>
    tpu.vector_store %arg7[%c1, %c0_21], %22 {strides = array<i32>} : memref<8x128xf32, #tpu.memory_space<vmem>>, vector<1x128xf32>,
    %c1_22 = arith.constant 1 : index
    %c0_23 = arith.constant 0 : index
    %28 = vector.load %arg8[%c1_22, %c0_23] : memref<8x128xf32, #tpu.memory_space<vmem>>, vector<1x128xf32>
    tpu.vector_store %arg8[%c1_22, %c0_23], %26 {strides = array<i32>} : memref<8x128xf32, #tpu.memory_space<vmem>>, vector<1x128xf32>,
    %29 = vector.extract_strided_slice %6 {offsets = [2, 0], sizes = [1, 128], strides = [1, 1]} : vector<8x128xf32> to vector<1x128xf32>
    %cst_24 = arith.constant dense<0.000000e+00> : vector<1x128xf32>
    %30 = tpu.matmul %22, %3, %cst_24 {dimension_numbers = #tpu.dot_dimension_numbers<[1], [0], [0], [1], [0, 0, 1, 1], [], []>} : vector<1x128xf32>, vector<128x128xf32>, vector<1x128xf32> -> vector<1x128xf32>
    %31 = arith.addf %29, %30 : vector<1x128xf32>
    %32 = math.tanh %31 : vector<1x128xf32>
    %cst_25 = arith.constant dense<0.000000e+00> : vector<1x128xf32>
    %33 = tpu.matmul %32, %4, %cst_25 {dimension_numbers = #tpu.dot_dimension_numbers<[1], [0], [0], [1], [0, 0, 1, 1], [], []>} : vector<1x128xf32>, vector<128x128xf32>, vector<1x128xf32> -> vector<1x128xf32>
    %cst_26 = arith.constant dense<0.000000e+00> : vector<1x128xf32>
    %34 = tpu.matmul %26, %5, %cst_26 {dimension_numbers = #tpu.dot_dimension_numbers<[1], [0], [0], [1], [0, 0, 1, 1], [], []>} : vector<1x128xf32>, vector<128x128xf32>, vector<1x128xf32> -> vector<1x128xf32>
    %35 = arith.addf %33, %34 : vector<1x128xf32>
    %36 = math.tanh %35 : vector<1x128xf32>
    %c2 = arith.constant 2 : index
    %c0_27 = arith.constant 0 : index
    %37 = vector.load %arg7[%c2, %c0_27] : memref<8x128xf32, #tpu.memory_space<vmem>>, vector<1x128xf32>
    tpu.vector_store %arg7[%c2, %c0_27], %32 {strides = array<i32>} : memref<8x128xf32, #tpu.memory_space<vmem>>, vector<1x128xf32>,
    %c2_28 = arith.constant 2 : index
    %c0_29 = arith.constant 0 : index
    %38 = vector.load %arg8[%c2_28, %c0_29] : memref<8x128xf32, #tpu.memory_space<vmem>>, vector<1x128xf32>
    tpu.vector_store %arg8[%c2_28, %c0_29], %36 {strides = array<i32>} : memref<8x128xf32, #tpu.memory_space<vmem>>, vector<1x128xf32>,
    %39 = vector.extract_strided_slice %6 {offsets = [3, 0], sizes = [1, 128], strides = [1, 1]} : vector<8x128xf32> to vector<1x128xf32>
    %cst_30 = arith.constant dense<0.000000e+00> : vector<1x128xf32>
    %40 = tpu.matmul %32, %3, %cst_30 {dimension_numbers = #tpu.dot_dimension_numbers<[1], [0], [0], [1], [0, 0, 1, 1], [], []>} : vector<1x128xf32>, vector<128x128xf32>, vector<1x128xf32> -> vector<1x128xf32>
    %41 = arith.addf %39, %40 : vector<1x128xf32>
    %42 = math.tanh %41 : vector<1x128xf32>
    %cst_31 = arith.constant dense<0.000000e+00> : vector<1x128xf32>
    %43 = tpu.matmul %42, %4, %cst_31 {dimension_numbers = #tpu.dot_dimension_numbers<[1], [0], [0], [1], [0, 0, 1, 1], [], []>} : vector<1x128xf32>, vector<128x128xf32>, vector<1x128xf32> -> vector<1x128xf32>
    %cst_32 = arith.constant dense<0.000000e+00> : vector<1x128xf32>
    %44 = tpu.matmul %36, %5, %cst_32 {dimension_numbers = #tpu.dot_dimension_numbers<[1], [0], [0], [1], [0, 0, 1, 1], [], []>} : vector<1x128xf32>, vector<128x128xf32>, vector<1x128xf32> -> vector<1x128xf32>
    %45 = arith.addf %43, %44 : vector<1x128xf32>
    %46 = math.tanh %45 : vector<1x128xf32>
    %c3 = arith.constant 3 : index
    %c0_33 = arith.constant 0 : index
    %47 = vector.load %arg7[%c3, %c0_33] : memref<8x128xf32, #tpu.memory_space<vmem>>, vector<1x128xf32>
    tpu.vector_store %arg7[%c3, %c0_33], %42 {strides = array<i32>} : memref<8x128xf32, #tpu.memory_space<vmem>>, vector<1x128xf32>,
    %c3_34 = arith.constant 3 : index
    %c0_35 = arith.constant 0 : index
    %48 = vector.load %arg8[%c3_34, %c0_35] : memref<8x128xf32, #tpu.memory_space<vmem>>, vector<1x128xf32>
    tpu.vector_store %arg8[%c3_34, %c0_35], %46 {strides = array<i32>} : memref<8x128xf32, #tpu.memory_space<vmem>>, vector<1x128xf32>,
    %49 = vector.extract_strided_slice %6 {offsets = [4, 0], sizes = [1, 128], strides = [1, 1]} : vector<8x128xf32> to vector<1x128xf32>
    %cst_36 = arith.constant dense<0.000000e+00> : vector<1x128xf32>
    %50 = tpu.matmul %42, %3, %cst_36 {dimension_numbers = #tpu.dot_dimension_numbers<[1], [0], [0], [1], [0, 0, 1, 1], [], []>} : vector<1x128xf32>, vector<128x128xf32>, vector<1x128xf32> -> vector<1x128xf32>
    %51 = arith.addf %49, %50 : vector<1x128xf32>
    %52 = math.tanh %51 : vector<1x128xf32>
    %cst_37 = arith.constant dense<0.000000e+00> : vector<1x128xf32>
    %53 = tpu.matmul %52, %4, %cst_37 {dimension_numbers = #tpu.dot_dimension_numbers<[1], [0], [0], [1], [0, 0, 1, 1], [], []>} : vector<1x128xf32>, vector<128x128xf32>, vector<1x128xf32> -> vector<1x128xf32>
    %cst_38 = arith.constant dense<0.000000e+00> : vector<1x128xf32>
    %54 = tpu.matmul %46, %5, %cst_38 {dimension_numbers = #tpu.dot_dimension_numbers<[1], [0], [0], [1], [0, 0, 1, 1], [], []>} : vector<1x128xf32>, vector<128x128xf32>, vector<1x128xf32> -> vector<1x128xf32>
    %55 = arith.addf %53, %54 : vector<1x128xf32>
    %56 = math.tanh %55 : vector<1x128xf32>
    %c4 = arith.constant 4 : index
    %c0_39 = arith.constant 0 : index
    %57 = vector.load %arg7[%c4, %c0_39] : memref<8x128xf32, #tpu.memory_space<vmem>>, vector<1x128xf32>
    tpu.vector_store %arg7[%c4, %c0_39], %52 {strides = array<i32>} : memref<8x128xf32, #tpu.memory_space<vmem>>, vector<1x128xf32>,
    %c4_40 = arith.constant 4 : index
    %c0_41 = arith.constant 0 : index
    %58 = vector.load %arg8[%c4_40, %c0_41] : memref<8x128xf32, #tpu.memory_space<vmem>>, vector<1x128xf32>
    tpu.vector_store %arg8[%c4_40, %c0_41], %56 {strides = array<i32>} : memref<8x128xf32, #tpu.memory_space<vmem>>, vector<1x128xf32>,
    %59 = vector.extract_strided_slice %6 {offsets = [5, 0], sizes = [1, 128], strides = [1, 1]} : vector<8x128xf32> to vector<1x128xf32>
    %cst_42 = arith.constant dense<0.000000e+00> : vector<1x128xf32>
    %60 = tpu.matmul %52, %3, %cst_42 {dimension_numbers = #tpu.dot_dimension_numbers<[1], [0], [0], [1], [0, 0, 1, 1], [], []>} : vector<1x128xf32>, vector<128x128xf32>, vector<1x128xf32> -> vector<1x128xf32>
    %61 = arith.addf %59, %60 : vector<1x128xf32>
    %62 = math.tanh %61 : vector<1x128xf32>
    %cst_43 = arith.constant dense<0.000000e+00> : vector<1x128xf32>
    %63 = tpu.matmul %62, %4, %cst_43 {dimension_numbers = #tpu.dot_dimension_numbers<[1], [0], [0], [1], [0, 0, 1, 1], [], []>} : vector<1x128xf32>, vector<128x128xf32>, vector<1x128xf32> -> vector<1x128xf32>
    %cst_44 = arith.constant dense<0.000000e+00> : vector<1x128xf32>
    %64 = tpu.matmul %56, %5, %cst_44 {dimension_numbers = #tpu.dot_dimension_numbers<[1], [0], [0], [1], [0, 0, 1, 1], [], []>} : vector<1x128xf32>, vector<128x128xf32>, vector<1x128xf32> -> vector<1x128xf32>
    %65 = arith.addf %63, %64 : vector<1x128xf32>
    %66 = math.tanh %65 : vector<1x128xf32>
    %c5 = arith.constant 5 : index
    %c0_45 = arith.constant 0 : index
    %67 = vector.load %arg7[%c5, %c0_45] : memref<8x128xf32, #tpu.memory_space<vmem>>, vector<1x128xf32>
    tpu.vector_store %arg7[%c5, %c0_45], %62 {strides = array<i32>} : memref<8x128xf32, #tpu.memory_space<vmem>>, vector<1x128xf32>,
    %c5_46 = arith.constant 5 : index
    %c0_47 = arith.constant 0 : index
    %68 = vector.load %arg8[%c5_46, %c0_47] : memref<8x128xf32, #tpu.memory_space<vmem>>, vector<1x128xf32>
    tpu.vector_store %arg8[%c5_46, %c0_47], %66 {strides = array<i32>} : memref<8x128xf32, #tpu.memory_space<vmem>>, vector<1x128xf32>,
    %69 = vector.extract_strided_slice %6 {offsets = [6, 0], sizes = [1, 128], strides = [1, 1]} : vector<8x128xf32> to vector<1x128xf32>
    %cst_48 = arith.constant dense<0.000000e+00> : vector<1x128xf32>
    %70 = tpu.matmul %62, %3, %cst_48 {dimension_numbers = #tpu.dot_dimension_numbers<[1], [0], [0], [1], [0, 0, 1, 1], [], []>} : vector<1x128xf32>, vector<128x128xf32>, vector<1x128xf32> -> vector<1x128xf32>
    %71 = arith.addf %69, %70 : vector<1x128xf32>
    %72 = math.tanh %71 : vector<1x128xf32>
    %cst_49 = arith.constant dense<0.000000e+00> : vector<1x128xf32>
    %73 = tpu.matmul %72, %4, %cst_49 {dimension_numbers = #tpu.dot_dimension_numbers<[1], [0], [0], [1], [0, 0, 1, 1], [], []>} : vector<1x128xf32>, vector<128x128xf32>, vector<1x128xf32> -> vector<1x128xf32>
    %cst_50 = arith.constant dense<0.000000e+00> : vector<1x128xf32>
    %74 = tpu.matmul %66, %5, %cst_50 {dimension_numbers = #tpu.dot_dimension_numbers<[1], [0], [0], [1], [0, 0, 1, 1], [], []>} : vector<1x128xf32>, vector<128x128xf32>, vector<1x128xf32> -> vector<1x128xf32>
    %75 = arith.addf %73, %74 : vector<1x128xf32>
    %76 = math.tanh %75 : vector<1x128xf32>
    %c6 = arith.constant 6 : index
    %c0_51 = arith.constant 0 : index
    %77 = vector.load %arg7[%c6, %c0_51] : memref<8x128xf32, #tpu.memory_space<vmem>>, vector<1x128xf32>
    tpu.vector_store %arg7[%c6, %c0_51], %72 {strides = array<i32>} : memref<8x128xf32, #tpu.memory_space<vmem>>, vector<1x128xf32>,
    %c6_52 = arith.constant 6 : index
    %c0_53 = arith.constant 0 : index
    %78 = vector.load %arg8[%c6_52, %c0_53] : memref<8x128xf32, #tpu.memory_space<vmem>>, vector<1x128xf32>
    tpu.vector_store %arg8[%c6_52, %c0_53], %76 {strides = array<i32>} : memref<8x128xf32, #tpu.memory_space<vmem>>, vector<1x128xf32>,
    %79 = vector.extract_strided_slice %6 {offsets = [7, 0], sizes = [1, 128], strides = [1, 1]} : vector<8x128xf32> to vector<1x128xf32>
    %cst_54 = arith.constant dense<0.000000e+00> : vector<1x128xf32>
    %80 = tpu.matmul %72, %3, %cst_54 {dimension_numbers = #tpu.dot_dimension_numbers<[1], [0], [0], [1], [0, 0, 1, 1], [], []>} : vector<1x128xf32>, vector<128x128xf32>, vector<1x128xf32> -> vector<1x128xf32>
    %81 = arith.addf %79, %80 : vector<1x128xf32>
    %82 = math.tanh %81 : vector<1x128xf32>
    %cst_55 = arith.constant dense<0.000000e+00> : vector<1x128xf32>
    %83 = tpu.matmul %82, %4, %cst_55 {dimension_numbers = #tpu.dot_dimension_numbers<[1], [0], [0], [1], [0, 0, 1, 1], [], []>} : vector<1x128xf32>, vector<128x128xf32>, vector<1x128xf32> -> vector<1x128xf32>
    %cst_56 = arith.constant dense<0.000000e+00> : vector<1x128xf32>
    %84 = tpu.matmul %76, %5, %cst_56 {dimension_numbers = #tpu.dot_dimension_numbers<[1], [0], [0], [1], [0, 0, 1, 1], [], []>} : vector<1x128xf32>, vector<128x128xf32>, vector<1x128xf32> -> vector<1x128xf32>
    %85 = arith.addf %83, %84 : vector<1x128xf32>
    %86 = math.tanh %85 : vector<1x128xf32>
    %c7 = arith.constant 7 : index
    %c0_57 = arith.constant 0 : index
    %87 = vector.load %arg7[%c7, %c0_57] : memref<8x128xf32, #tpu.memory_space<vmem>>, vector<1x128xf32>
    tpu.vector_store %arg7[%c7, %c0_57], %82 {strides = array<i32>} : memref<8x128xf32, #tpu.memory_space<vmem>>, vector<1x128xf32>,
    %c7_58 = arith.constant 7 : index
    %c0_59 = arith.constant 0 : index
    %88 = vector.load %arg8[%c7_58, %c0_59] : memref<8x128xf32, #tpu.memory_space<vmem>>, vector<1x128xf32>
    tpu.vector_store %arg8[%c7_58, %c0_59], %86 {strides = array<i32>} : memref<8x128xf32, #tpu.memory_space<vmem>>, vector<1x128xf32>,
    %c0_60 = arith.constant 0 : index
    %c0_61 = arith.constant 0 : index
    %89 = vector.load %arg9[%c0_60, %c0_61] : memref<1x128xf32, #tpu.memory_space<vmem>>, vector<1x128xf32>
    tpu.vector_store %arg9[%c0_60, %c0_61], %82 {strides = array<i32>} : memref<1x128xf32, #tpu.memory_space<vmem>>, vector<1x128xf32>,
    %c0_62 = arith.constant 0 : index
    %c0_63 = arith.constant 0 : index
    %90 = vector.load %arg10[%c0_62, %c0_63] : memref<1x128xf32, #tpu.memory_space<vmem>>, vector<1x128xf32>
    tpu.vector_store %arg10[%c0_62, %c0_63], %86 {strides = array<i32>} : memref<1x128xf32, #tpu.memory_space<vmem>>, vector<1x128xf32>,
    return
  }
  func.func @transform_0(%arg0: i32) -> (i32, i32) {
    %c0_i32 = arith.constant 0 : i32
    %c0_i32_0 = arith.constant 0 : i32
    return %arg0, %c0_i32 : i32, i32
  }
  func.func @transform_1(%arg0: i32) -> (i32, i32) {
    %c0_i32 = arith.constant 0 : i32
    %c0_i32_0 = arith.constant 0 : i32
    %c0_i32_1 = arith.constant 0 : i32
    return %c0_i32, %c0_i32_0 : i32, i32
  }
  func.func @transform_2(%arg0: i32) -> (i32, i32) {
    %c0_i32 = arith.constant 0 : i32
    %c0_i32_0 = arith.constant 0 : i32
    %c0_i32_1 = arith.constant 0 : i32
    return %c0_i32, %c0_i32_0 : i32, i32
  }
  func.func @transform_3(%arg0: i32) -> (i32, i32) {
    %c0_i32 = arith.constant 0 : i32
    %c0_i32_0 = arith.constant 0 : i32
    %c0_i32_1 = arith.constant 0 : i32
    return %c0_i32, %c0_i32_0 : i32, i32
  }
  func.func @transform_4(%arg0: i32) -> (i32, i32) {
    %c0_i32 = arith.constant 0 : i32
    %c0_i32_0 = arith.constant 0 : i32
    %c0_i32_1 = arith.constant 0 : i32
    return %c0_i32, %c0_i32_0 : i32, i32
  }
  func.func @transform_5(%arg0: i32) -> (i32, i32) {
    %c0_i32 = arith.constant 0 : i32
    %c0_i32_0 = arith.constant 0 : i32
    %c0_i32_1 = arith.constant 0 : i32
    return %c0_i32, %c0_i32_0 : i32, i32
  }
  func.func @transform_6(%arg0: i32) -> (i32, i32) {
    %c0_i32 = arith.constant 0 : i32
    %c0_i32_0 = arith.constant 0 : i32
    return %arg0, %c0_i32 : i32, i32
  }
  func.func @transform_7(%arg0: i32) -> (i32, i32) {
    %c0_i32 = arith.constant 0 : i32
    %c0_i32_0 = arith.constant 0 : i32
    return %arg0, %c0_i32 : i32, i32
  }
}

</mosaic_0001>

<bundles_post_ra>
// kernel: chemical_rnn_sequence.1
= control target key start
LH: loop header
LB: loop body
LE: loop exit
PB: predicated region body
PF: predicated region fallthrough
CT: control target
= control target key end

     0   :  { %13 = vsyncpa [#allocation5], 0  ;;  %s4521_s0 = inlined_call_operand.vmem [shape: f32[8,128], index: 0, kind: input, shape index: {}]   ;;  %s4522_s1 = inlined_call_operand.vmem [shape: f32[1,128], index: 1, kind: input, shape index: {}]   ;;  %s4523_s2 = inlined_call_operand.vmem [shape: f32[1,128], index: 2, kind: input, shape index: {}]   ;;  %s4524_s3 = inlined_call_operand.hbm [shape: f32[128,128], index: 3, kind: input, shape index: {}]   ;;  %s4525_s4 = inlined_call_operand.hbm [shape: f32[128,128], index: 4, kind: input, shape index: {}]   ;;  %s4526_s5 = inlined_call_operand.hbm [shape: f32[128,128], index: 5, kind: input, shape index: {}]   ;;  %s4527_s6 = inlined_call_operand.hbm [shape: f32[8,128], index: 6, kind: output, shape index: {0}]   ;;  %s4528_s7 = inlined_call_operand.vmem [shape: f32[8,128], index: 7, kind: output, shape index: {1}]  }
   0x1   :  { %14 = vsyncpa [#allocation8], 0 }
   0x2   :  { %15 = vsyncpa [#allocation6], 0  ;;  %s3885_s24 = smov [#allocation7]   ;;  %s3886_s26 = smov [#allocation4]  }
   0x3   :  { %s39_s25 = sshll.u32 %s3885_s24, 4  ;;  %s27_s27 = sshll.u32 %s3886_s26, 4  ;;  %s40_s25 = int_to_ptr.vmem [resolvable:$true] %s39_s25  ;;  %s3934_s27 = int_to_ptr.vmem [resolvable:$true] %s27_s27 }
   0x4   :  { %s3791_s30 = scalar_lea.hbm %s4525_s4, 2048 }
   0x5   :  { %p3792_p0 = scmp.ne.s32.totalorder %s4525_s4, %s3791_s30  ;;  %p3795_p1 = scmp.lt.u32.totalorder %s3791_s30, %s4525_s4 }
   0x7   :  { %p3797_p2 = pnand %p3795_p1, %p3792_p0 }
   0x9   :  { %3800 = shalt.err (!%p3797_p2)
}
   0xa   :  { %s3801_s12 = scalar_lea.vmem %s40_s25, 2048  ;;  %p3806_p4 = scmp.lt.s32.totalorder %s40_s25, %s40_s25 }
   0xb   :  { %p3802_p3 = scmp.ne.s32.totalorder %s40_s25, %s3801_s12  ;;  %p3807_p5 = scmp.lt.s32.totalorder %s3801_s12, %s3801_s12 }
   0xd   :  { %p3808_p6 = por %p3807_p5, %p3806_p4 }
   0xf   :  { %p3809_p7 = pnand %p3808_p6, %p3802_p3 }
  0x11   :  { %3812 = shalt.err (!%p3809_p7)
}
  0x12   :  { %s3887_s13 = smov 128   ;;  %s3888_s14 = smov 8  }
  0x13   :  { %45 = dma.hbm_to_vmem [thread:$0]  %s4525_s4, 2048, %s40_s25, [#allocation8], %s3887_s13, %s3887_s13, %s3888_s14  }
  0x14   :  { %s3813_s19 = scalar_lea.hbm %s4524_s3, 2048 }
  0x15   :  { %p3814_p8 = scmp.ne.s32.totalorder %s4524_s3, %s3813_s19  ;;  %p3817_p9 = scmp.lt.u32.totalorder %s3813_s19, %s4524_s3 }
  0x17   :  { %p3819_p10 = pnand %p3817_p9, %p3814_p8 }
  0x19   :  { %3822 = shalt.err (!%p3819_p10)
}
  0x1a   :  { %s3823_s24 = scalar_lea.vmem %s3934_s27, 2048  ;;  %p3828_p12 = scmp.lt.s32.totalorder %s3934_s27, %s3934_s27 }
  0x1b   :  { %p3824_p11 = scmp.ne.s32.totalorder %s3934_s27, %s3823_s24  ;;  %p3829_p13 = scmp.lt.s32.totalorder %s3823_s24, %s3823_s24 }
  0x1d   :  { %p3830_p0 = por %p3829_p13, %p3828_p12 }
  0x1f   :  { %p3831_p1 = pnand %p3830_p0, %p3824_p11 }
  0x21   :  { %3834 = shalt.err (!%p3831_p1)
}
  0x22   :  { %33 = dma.hbm_to_vmem [thread:$0]  %s4524_s3, 2048, %s3934_s27, [#allocation5], %s3887_s13, %s3887_s13, %s3888_s14  }
  0x23   :  { %s3889_s26 = smov [#allocation9]   ;;  %s3835_s8 = scalar_lea.hbm %s4526_s5, 2048 }
  0x24   :  { %s51_s28 = sshll.u32 %s3889_s26, 4  ;;  %p3836_p2 = scmp.ne.s32.totalorder %s4526_s5, %s3835_s8  ;;  %s52_s28 = int_to_ptr.vmem [resolvable:$true] %s51_s28 }
  0x25   :  { %p3839_p3 = scmp.lt.u32.totalorder %s3835_s8, %s4526_s5 }
  0x27   :  { %p3841_p4 = pnand %p3839_p3, %p3836_p2 }
  0x29   :  { %3844 = shalt.err (!%p3841_p4)
}
  0x2a   :  { %s3845_s15 = scalar_lea.vmem %s52_s28, 2048  ;;  %p3850_p6 = scmp.lt.s32.totalorder %s52_s28, %s52_s28 }
  0x2b   :  { %p3846_p5 = scmp.ne.s32.totalorder %s52_s28, %s3845_s15  ;;  %p3851_p7 = scmp.lt.s32.totalorder %s3845_s15, %s3845_s15 }
  0x2d   :  { %p3852_p8 = por %p3851_p7, %p3850_p6 }
  0x2f   :  { %p3853_p9 = pnand %p3852_p8, %p3846_p5 }
  0x31   :  { %3856 = shalt.err (!%p3853_p9)
}
  0x32   :  { %57 = dma.hbm_to_vmem [thread:$0]  %s4526_s5, 2048, %s52_s28, [#allocation8], %s3887_s13, %s3887_s13, %s3888_s14  }
  0x33   :  { %3879 = dma.done.wait [#allocation5], 2048  }
  0x34   :  { %3880 = vsyncadd [#allocation5], 4294965248 }
  0x35   :  { %3881 = dma.done.wait [#allocation8], 4096  }
  0x36   :  { %3882 = vsyncadd [#allocation8], 4294963200  ;;  %v3890_v0 = vmov 0.0|0.0   ;;  %vm3891_vm0 = vmmov 0   ;;  %v3892_v1 = vmov 0.0   ;;  %v75_v2 = vld [vmem:[#allocation4] sm:$0xff] }
  0x37   :  { %3158 = vmatprep.subr.bf16.mxu1 %v3890_v0  ;;  %2350 = vmatprep.mubr.msk.f32.mxu1 %vm3891_vm0, %v3892_v1  ;;  %v76_v3 = vld [vmem:[#allocation4 + $0x8] sm:$0xff]  ;;  %v77_v4 = vld [vmem:[#allocation4 + $0x10] sm:$0xff]  ;;  %v78_v6 = vld [vmem:[#allocation4 + $0x18] sm:$0xff]  ;;  %s3893_s30 = smov [#allocation10]  }
  0x38   :  { %3230 = vmatprep.subr.bf16.mxu0 %v3890_v0  ;;  %2455 = vmatprep.mubr.msk.f32.mxu0 %vm3891_vm0, %v3892_v1  ;;  %v3992_v5 = vpack.c.bf16 %v76_v3, %v75_v2  ;;  %v3995_v7 = vpack.c.bf16 %v78_v6, %v77_v4  ;;  %v79_v8 = vld [vmem:[#allocation4 + $0x20] sm:$0xff]  ;;  %v80_v9 = vld [vmem:[#allocation4 + $0x28] sm:$0xff]  ;;  %v71_v10 = vld [vmem:[%s4522_s1] sm:$0x1]  ;;  %s1896_s8 = sshll.u32 %s3893_s30, 4  ;;  %s1897_s8 = int_to_ptr.vmem [resolvable:$true] %s1896_s8 }
  0x39   :  { %72 = vst [vmem:[#allocation2] sm:$0x1] %v71_v10  ;;  %v4004_v11 = vpack.c.bf16 %v80_v9, %v79_v8  ;;  %v81_v12 = vld [vmem:[#allocation4 + $0x30] sm:$0xff]  ;;  %v82_v13 = vld [vmem:[#allocation4 + $0x38] sm:$0xff]  ;;  %v83_v16 = vld [vmem:[#allocation4 + $0x40] sm:$0xff]  ;;  %s3857_s9 = scalar_lea.vmem %s1897_s8, 128  ;;  %p3862_p11 = scmp.lt.s32.totalorder %s1897_s8, %s1897_s8 }
  0x3a   :  { %3160 = vmatpush3.bf16.msra.mxu1 %v3992_v5  ;;  %3232 = vmatpush3.bf16.msra.mxu0 %v3992_v5  ;;  %v4010_v14 = vpack.c.bf16 %v82_v13, %v81_v12  ;;  %v73_v15 = vld [vmem:[%s4523_s2] sm:$0x1]  ;;  %v84_v17 = vld [vmem:[#allocation4 + $0x48] sm:$0xff]  ;;  %v85_v19 = vld [vmem:[#allocation4 + $0x50] sm:$0xff]  ;;  %p3858_p10 = scmp.ne.s32.totalorder %s1897_s8, %s3857_s9  ;;  %p3863_p12 = scmp.lt.s32.totalorder %s3857_s9, %s3857_s9 }
  0x3b   :  { %3161 = vmatprep.subr.bf16.mxu1 %v3890_v0  ;;  %3233 = vmatprep.subr.bf16.mxu0 %v3890_v0  ;;  %74 = vst [vmem:[#allocation3] sm:$0x1] %v73_v15  ;;  %v4019_v18 = vpack.c.bf16 %v84_v17, %v83_v16  ;;  %v86_v20 = vld [vmem:[#allocation4 + $0x58] sm:$0xff]  ;;  %v87_v22 = vld [vmem:[#allocation4 + $0x60] sm:$0xff]  ;;  %v88_v23 = vld [vmem:[#allocation4 + $0x68] sm:$0xff] }
  0x3c   :  { %v4025_v21 = vpack.c.bf16 %v86_v20, %v85_v19  ;;  %v4031_v24 = vpack.c.bf16 %v88_v23, %v87_v22  ;;  %v89_v25 = vld [vmem:[#allocation4 + $0x70] sm:$0xff]  ;;  %v90_v26 = vld [vmem:[#allocation4 + $0x78] sm:$0xff]  ;;  %v107_v28 = vld [vmem:[#allocation9] sm:$0xff]  ;;  %p3864_p13 = por %p3863_p12, %p3862_p11 }
  0x3d   :  { %v4037_v27 = vpack.c.bf16 %v90_v26, %v89_v25  ;;  %v108_v29 = vld [vmem:[#allocation9 + $0x8] sm:$0xff]  ;;  %v109_v32 = vld [vmem:[#allocation9 + $0x10] sm:$0xff]  ;;  %v110_v33 = vld [vmem:[#allocation9 + $0x18] sm:$0xff] }
  0x3e   :  { %3163 = vmatpush3.bf16.msra.mxu1 %v3995_v7  ;;  %3235 = vmatpush3.bf16.msra.mxu0 %v3995_v7  ;;  %v4043_v31 = vpack.c.bf16 %v108_v29, %v107_v28  ;;  %v4049_v34 = vpack.c.bf16 %v110_v33, %v109_v32  ;;  %v111_v35 = vld [vmem:[#allocation9 + $0x20] sm:$0xff]  ;;  %v112_v36 = vld [vmem:[#allocation9 + $0x28] sm:$0xff]  ;;  %v113_v38 = vld [vmem:[#allocation9 + $0x30] sm:$0xff]  ;;  %p3865_p0 = pnand %p3864_p13, %p3858_p10 }
  0x3f   :  { %3164 = vmatprep.subr.bf16.mxu1 %v3890_v0  ;;  %3236 = vmatprep.subr.bf16.mxu0 %v3890_v0  ;;  %v4055_v37 = vpack.c.bf16 %v112_v36, %v111_v35  ;;  %v114_v39 = vld [vmem:[#allocation9 + $0x38] sm:$0xff]  ;;  %v115_v41 = vld [vmem:[#allocation9 + $0x40] sm:$0xff]  ;;  %v116_v42 = vld [vmem:[#allocation9 + $0x48] sm:$0xff] }
  0x40   :  { %v124_v30 = vld [vmem:[#allocation2] sm:$0x1]  ;;  %v4059_v40 = vpack.c.bf16 %v114_v39, %v113_v38  ;;  %v4063_v43 = vpack.c.bf16 %v116_v42, %v115_v41  ;;  %v117_v44 = vld [vmem:[#allocation9 + $0x50] sm:$0xff]  ;;  %v119_v47 = vld [vmem:[#allocation9 + $0x60] sm:$0xff] }
  0x41   :  { %v118_v45 = vld [vmem:[#allocation9 + $0x58] sm:$0xff]  ;;  %v120_v48 = vld [vmem:[#allocation9 + $0x68] sm:$0xff]  ;;  %v121_v50 = vld [vmem:[#allocation9 + $0x70] sm:$0xff] }
  0x42   :  { %3166 = vmatpush3.bf16.msra.mxu1 %v4004_v11  ;;  %3238 = vmatpush3.bf16.msra.mxu0 %v4004_v11  ;;  %v4067_v46 = vpack.c.bf16 %v118_v45, %v117_v44  ;;  %v4071_v49 = vpack.c.bf16 %v120_v48, %v119_v47  ;;  %v122_v51 = vld [vmem:[#allocation9 + $0x78] sm:$0xff]  ;;  %v91_v53 = vld [vmem:[#allocation7] sm:$0xff]  ;;  %v92_v54 = vld [vmem:[#allocation7 + $0x8] sm:$0xff] }
  0x43   :  { %3167 = vmatprep.subr.bf16.mxu1 %v3890_v0  ;;  %3239 = vmatprep.subr.bf16.mxu0 %v3890_v0  ;;  %v4075_v52 = vpack.c.bf16 %v122_v51, %v121_v50  ;;  %v125_v55 = vld [vmem:[#allocation3] sm:$0x1]  ;;  %v4079_v56 = vpack.c.bf16 %v92_v54, %v91_v53  ;;  %v93_v57 = vld [vmem:[#allocation7 + $0x10] sm:$0xff]  ;;  %v95_v60 = vld [vmem:[#allocation7 + $0x20] sm:$0xff] }
  0x44   :  { %v94_v58 = vld [vmem:[#allocation7 + $0x18] sm:$0xff]  ;;  %v96_v61 = vld [vmem:[#allocation7 + $0x28] sm:$0xff]  ;;  %v97_v63 = vld [vmem:[#allocation7 + $0x30] sm:$0xff] }
  0x45   :  { %v4083_v59 = vpack.c.bf16 %v94_v58, %v93_v57  ;;  %v4089_v62 = vpack.c.bf16 %v96_v61, %v95_v60  ;;  %v98_v2 = vld [vmem:[#allocation7 + $0x38] sm:$0xff]  ;;  %v99_v4 = vld [vmem:[#allocation7 + $0x40] sm:$0xff]  ;;  %v100_v6 = vld [vmem:[#allocation7 + $0x48] sm:$0xff] }
  0x46   :  { %3169 = vmatpush3.bf16.msra.mxu1 %v4010_v14  ;;  %3241 = vmatpush3.bf16.msra.mxu0 %v4010_v14  ;;  %v4093_v3 = vpack.c.bf16 %v98_v2, %v97_v63  ;;  %v4097_v8 = vpack.c.bf16 %v100_v6, %v99_v4  ;;  %v101_v9 = vld [vmem:[#allocation7 + $0x50] sm:$0xff]  ;;  %v102_v10 = vld [vmem:[#allocation7 + $0x58] sm:$0xff]  ;;  %v103_v13 = vld [vmem:[#allocation7 + $0x60] sm:$0xff] }
  0x47   :  { %3170 = vmatprep.subr.bf16.mxu1 %v3890_v0  ;;  %3242 = vmatprep.subr.bf16.mxu0 %v3890_v0  ;;  %v4102_v12 = vpack.c.bf16 %v102_v10, %v101_v9  ;;  %v104_v15 = vld [vmem:[#allocation7 + $0x68] sm:$0xff]  ;;  %v105_v17 = vld [vmem:[#allocation7 + $0x70] sm:$0xff]  ;;  %v106_v19 = vld [vmem:[#allocation7 + $0x78] sm:$0xff] }
  0x48   :  { %v4106_v16 = vpack.c.bf16 %v104_v15, %v103_v13  ;;  %v4110_v20 = vpack.c.bf16 %v106_v19, %v105_v17  ;;  %v4117_v22 = vld [vmem:[%s4521_s0] sm:$0xff] }
  0x4a   :  { %3172 = vmatpush3.bf16.msra.mxu1 %v4019_v18  ;;  %3244 = vmatpush3.bf16.msra.mxu0 %v4019_v18 }
  0x4b   :  { %3173 = vmatprep.subr.bf16.mxu1 %v3890_v0  ;;  %3245 = vmatprep.subr.bf16.mxu0 %v3890_v0 }
  0x4e   :  { %3175 = vmatpush3.bf16.msra.mxu1 %v4025_v21  ;;  %3247 = vmatpush3.bf16.msra.mxu0 %v4025_v21 }
  0x4f   :  { %3176 = vmatprep.subr.bf16.mxu1 %v3890_v0  ;;  %3248 = vmatprep.subr.bf16.mxu0 %v3890_v0 }
  0x52   :  { %3178 = vmatpush3.bf16.msra.mxu1 %v4031_v24  ;;  %3250 = vmatpush3.bf16.msra.mxu0 %v4031_v24 }
  0x53   :  { %3179 = vmatprep.subr.bf16.mxu1 %v3890_v0  ;;  %3251 = vmatprep.subr.bf16.mxu0 %v3890_v0 }
  0x56   :  { %3181 = vmatpush3.bf16.msra.mxu1 %v4037_v27  ;;  %3253 = vmatpush3.bf16.msra.mxu0 %v4037_v27 }
  0x57   :  { %3182 = vmatprep.subr.bf16.mxu1 %v3890_v0  ;;  %3254 = vmatprep.subr.bf16.mxu0 %v3890_v0 }
  0x59   :  { %2351 = vmatmul.mubr.f32.vlgmr.msra.gmra.mrb[0].mxu1 %v124_v30 }
  0x5a   :  { %3184 = vmatpush3.bf16.msra.mxu1 %v4043_v31  ;;  %2385 = vmatprep.mubr.msk.f32.mxu1 %vm3891_vm0, %v3892_v1 }
  0x5b   :  { %3185 = vmatprep.subr.bf16.mxu1 %v3890_v0 }
  0x5e   :  { %3187 = vmatpush3.bf16.msra.mxu1 %v4049_v34 }
  0x5f   :  { %3188 = vmatprep.subr.bf16.mxu1 %v3890_v0 }
  0x62   :  { %3190 = vmatpush3.bf16.msra.mxu1 %v4055_v37 }
  0x63   :  { %3191 = vmatprep.subr.bf16.mxu1 %v3890_v0 }
  0x66   :  { %3193 = vmatpush3.bf16.msra.mxu1 %v4059_v40 }
  0x67   :  { %3194 = vmatprep.subr.bf16.mxu1 %v3890_v0 }
  0x6a   :  { %3196 = vmatpush3.bf16.msra.mxu1 %v4063_v43 }
  0x6b   :  { %3197 = vmatprep.subr.bf16.mxu1 %v3890_v0 }
  0x6e   :  { %3199 = vmatpush3.bf16.msra.mxu1 %v4067_v46 }
  0x6f   :  { %3200 = vmatprep.subr.bf16.mxu1 %v3890_v0 }
  0x72   :  { %3202 = vmatpush3.bf16.msra.mxu1 %v4071_v49 }
  0x73   :  { %3203 = vmatprep.subr.bf16.mxu1 %v3890_v0 }
  0x76   :  { %3205 = vmatpush3.bf16.msra.mxu1 %v4075_v52 }
  0x77   :  { %3206 = vmatprep.subr.bf16.mxu1 %v3890_v0 }
  0x79   :  { %2386 = vmatmul.mubr.f32.vlgmr.msra.gmra.mrb[2].mxu1 %v125_v55 }
  0x7a   :  { %3208 = vmatpush3.bf16.msra.mxu1 %v4079_v56  ;;  %2420 = vmatprep.mubr.msk.f32.mxu1 %vm3891_vm0, %v3892_v1 }
  0x7b   :  { %3209 = vmatprep.subr.bf16.mxu1 %v3890_v0 }
  0x7e   :  { %3211 = vmatpush3.bf16.msra.mxu1 %v4083_v59 }
  0x7f   :  { %3212 = vmatprep.subr.bf16.mxu1 %v3890_v0 }
  0x82   :  { %3214 = vmatpush3.bf16.msra.mxu1 %v4089_v62 }
  0x83   :  { %3215 = vmatprep.subr.bf16.mxu1 %v3890_v0 }
  0x86   :  { %3217 = vmatpush3.bf16.msra.mxu1 %v4093_v3 }
  0x87   :  { %3218 = vmatprep.subr.bf16.mxu1 %v3890_v0 }
  0x8a   :  { %3220 = vmatpush3.bf16.msra.mxu1 %v4097_v8 }
  0x8b   :  { %3221 = vmatprep.subr.bf16.mxu1 %v3890_v0 }
  0x8e   :  { %3223 = vmatpush3.bf16.msra.mxu1 %v4102_v12 }
  0x8f   :  { %3224 = vmatprep.subr.bf16.mxu1 %v3890_v0 }
  0x92   :  { %3226 = vmatpush3.bf16.msra.mxu1 %v4106_v16 }
  0x93   :  { %3227 = vmatprep.subr.bf16.mxu1 %v3890_v0 }
  0x96   :  { %3229 = vmatpush3.bf16.msra.mxu1 %v4110_v20 }
  0x97   :  { %3302 = vmatprep.subr.bf16.mxu1 %v3890_v0 }
 0x12c   :  { %v192_v23 = vpop.f32.mrb[0].mxu1 }
 0x12d   :  { %v196_v25 = vadd.f32 %v192_v23, %v4117_v22  ;;  %v2352_v26 = vpop.f32.mrb[1].mxu1 }
 0x12f   :  { %3759 = vtanh.f32 %v196_v25 }
 0x139   :  { %v3760_v28 = vpop.eup %3759 }
 0x13a   :  { %339 = vst [vmem:[#allocation10] sm:$0x1] %v3760_v28  ;;  %2421 = vmatmul.mubr.f32.vlgmr.msra.gmra.mrb[2].mxu1 %v3760_v28  ;;  %2456 = vmatmul.mubr.f32.vlgmr.msra.gmra.mrb[0].mxu0 %v3760_v28 }
 0x13b   :  { %3256 = vmatpush3.bf16.msra.mxu0 %v4043_v31  ;;  %3304 = vmatpush3.bf16.msra.mxu1 %v3992_v5 }
 0x13c   :  { %3257 = vmatprep.subr.bf16.mxu0 %v3890_v0  ;;  %3305 = vmatprep.subr.bf16.mxu1 %v3890_v0 }
 0x13d   :  { %2490 = vmatprep.mubr.msk.f32.mxu0 %vm3891_vm0, %v3892_v1  ;;  %2560 = vmatprep.mubr.msk.f32.mxu1 %vm3891_vm0, %v3892_v1 }
 0x13f   :  { %3259 = vmatpush3.bf16.msra.mxu0 %v4049_v34  ;;  %3307 = vmatpush3.bf16.msra.mxu1 %v3995_v7 }
 0x140   :  { %3260 = vmatprep.subr.bf16.mxu0 %v3890_v0  ;;  %3308 = vmatprep.subr.bf16.mxu1 %v3890_v0 }
 0x143   :  { %3262 = vmatpush3.bf16.msra.mxu0 %v4055_v37  ;;  %3310 = vmatpush3.bf16.msra.mxu1 %v4004_v11 }
 0x144   :  { %3263 = vmatprep.subr.bf16.mxu0 %v3890_v0  ;;  %3311 = vmatprep.subr.bf16.mxu1 %v3890_v0 }
 0x147   :  { %3265 = vmatpush3.bf16.msra.mxu0 %v4059_v40  ;;  %3313 = vmatpush3.bf16.msra.mxu1 %v4010_v14 }
 0x148   :  { %3266 = vmatprep.subr.bf16.mxu0 %v3890_v0  ;;  %3314 = vmatprep.subr.bf16.mxu1 %v3890_v0 }
 0x14b   :  { %3268 = vmatpush3.bf16.msra.mxu0 %v4063_v43  ;;  %3316 = vmatpush3.bf16.msra.mxu1 %v4019_v18 }
 0x14c   :  { %3269 = vmatprep.subr.bf16.mxu0 %v3890_v0  ;;  %3317 = vmatprep.subr.bf16.mxu1 %v3890_v0 }
 0x14f   :  { %3271 = vmatpush3.bf16.msra.mxu0 %v4067_v46  ;;  %3319 = vmatpush3.bf16.msra.mxu1 %v4025_v21 }
 0x150   :  { %3272 = vmatprep.subr.bf16.mxu0 %v3890_v0  ;;  %3320 = vmatprep.subr.bf16.mxu1 %v3890_v0 }
 0x153   :  { %3274 = vmatpush3.bf16.msra.mxu0 %v4071_v49  ;;  %3322 = vmatpush3.bf16.msra.mxu1 %v4031_v24 }
 0x154   :  { %3275 = vmatprep.subr.bf16.mxu0 %v3890_v0  ;;  %3323 = vmatprep.subr.bf16.mxu1 %v3890_v0 }
 0x157   :  { %3277 = vmatpush3.bf16.msra.mxu0 %v4075_v52  ;;  %3325 = vmatpush3.bf16.msra.mxu1 %v4037_v27 }
 0x158   :  { %3278 = vmatprep.subr.bf16.mxu0 %v3890_v0  ;;  %3326 = vmatprep.subr.bf16.mxu1 %v3890_v0 }
 0x20d   :  { %v334_v29 = vpop.f32.mrb[2].mxu1  ;;  %v407_v30 = vpop.f32.mrb[0].mxu0 }
 0x20e   :  { %3761 = vtanh.f32 %v334_v29  ;;  %v412_v32 = vrot.slane %v407_v30, 7  ;;  %v2422_v33 = vpop.f32.mrb[3].mxu1  ;;  %v2457_v35 = vpop.f32.mrb[1].mxu0 }
 0x210   :  { %v414_v36 = vadd.f32 %v412_v32, %v4117_v22 }
 0x212   :  { %3763 = vtanh.f32 %v414_v36 }
 0x218   :  { %v3762_v38 = vpop.eup %3761 }
 0x219   :  { %340 = vst [vmem:[%s4528_s7] sm:$0x1] %v3762_v38  ;;  %2491 = vmatmul.mubr.f32.vlgmr.msra.gmra.mrb[2].mxu0 %v3762_v38 }
 0x21a   :  { %3280 = vmatpush3.bf16.msra.mxu0 %v4079_v56  ;;  %2525 = vmatprep.mubr.msk.f32.mxu0 %vm3891_vm0, %v3892_v1 }
 0x21b   :  { %3281 = vmatprep.subr.bf16.mxu0 %v3890_v0 }
 0x21c   :  { %v3764_v39 = vpop.eup %3763 }
 0x21d   :  { %560 = vst [vmem:[#allocation10] sm:$0x2] %v3764_v39  ;;  %v487_v41 = vrot.slane %v3764_v39, 1 }
 0x21e   :  { %3283 = vmatpush3.bf16.msra.mxu0 %v4083_v59 }
 0x21f   :  { %2561 = vmatmul.mubr.f32.vlgmr.msra.gmra.mrb[4].mxu1 %v487_v41  ;;  %3284 = vmatprep.subr.bf16.mxu0 %v3890_v0 }
 0x220   :  { %3328 = vmatpush3.bf16.msra.mxu1 %v4043_v31  ;;  %2595 = vmatprep.mubr.msk.f32.mxu1 %vm3891_vm0, %v3892_v1 }
 0x221   :  { %3329 = vmatprep.subr.bf16.mxu1 %v3890_v0 }
 0x222   :  { %3286 = vmatpush3.bf16.msra.mxu0 %v4089_v62 }
 0x223   :  { %3287 = vmatprep.subr.bf16.mxu0 %v3890_v0 }
 0x224   :  { %3331 = vmatpush3.bf16.msra.mxu1 %v4049_v34 }
 0x225   :  { %3332 = vmatprep.subr.bf16.mxu1 %v3890_v0 }
 0x226   :  { %3289 = vmatpush3.bf16.msra.mxu0 %v4093_v3 }
 0x227   :  { %3290 = vmatprep.subr.bf16.mxu0 %v3890_v0 }
 0x228   :  { %3334 = vmatpush3.bf16.msra.mxu1 %v4055_v37 }
 0x229   :  { %3335 = vmatprep.subr.bf16.mxu1 %v3890_v0 }
 0x22a   :  { %3292 = vmatpush3.bf16.msra.mxu0 %v4097_v8 }
 0x22b   :  { %3293 = vmatprep.subr.bf16.mxu0 %v3890_v0 }
 0x22c   :  { %3337 = vmatpush3.bf16.msra.mxu1 %v4059_v40 }
 0x22d   :  { %3338 = vmatprep.subr.bf16.mxu1 %v3890_v0 }
 0x22e   :  { %3295 = vmatpush3.bf16.msra.mxu0 %v4102_v12 }
 0x22f   :  { %3296 = vmatprep.subr.bf16.mxu0 %v3890_v0 }
 0x230   :  { %3340 = vmatpush3.bf16.msra.mxu1 %v4063_v43 }
 0x231   :  { %3341 = vmatprep.subr.bf16.mxu1 %v3890_v0 }
 0x232   :  { %3298 = vmatpush3.bf16.msra.mxu0 %v4106_v16 }
 0x233   :  { %3299 = vmatprep.subr.bf16.mxu0 %v3890_v0 }
 0x234   :  { %3343 = vmatpush3.bf16.msra.mxu1 %v4067_v46 }
 0x235   :  { %3344 = vmatprep.subr.bf16.mxu1 %v3890_v0 }
 0x236   :  { %3301 = vmatpush3.bf16.msra.mxu0 %v4110_v20 }
 0x237   :  { %3374 = vmatprep.subr.bf16.mxu0 %v3890_v0 }
 0x238   :  { %3346 = vmatpush3.bf16.msra.mxu1 %v4071_v49 }
 0x239   :  { %2526 = vmatmul.mubr.f32.vlgmr.msra.gmra.mrb[2].mxu0 %v487_v41  ;;  %3347 = vmatprep.subr.bf16.mxu1 %v3890_v0 }
 0x23a   :  { %3376 = vmatpush3.bf16.msra.mxu0 %v3992_v5  ;;  %2665 = vmatprep.mubr.msk.f32.mxu0 %vm3891_vm0, %v3892_v1 }
 0x23b   :  { %3377 = vmatprep.subr.bf16.mxu0 %v3890_v0 }
 0x23c   :  { %3349 = vmatpush3.bf16.msra.mxu1 %v4075_v52 }
 0x23d   :  { %3350 = vmatprep.subr.bf16.mxu1 %v3890_v0 }
 0x23e   :  { %3379 = vmatpush3.bf16.msra.mxu0 %v3995_v7 }
 0x23f   :  { %3380 = vmatprep.subr.bf16.mxu0 %v3890_v0 }
 0x242   :  { %3382 = vmatpush3.bf16.msra.mxu0 %v4004_v11 }
 0x243   :  { %3383 = vmatprep.subr.bf16.mxu0 %v3890_v0 }
 0x246   :  { %3385 = vmatpush3.bf16.msra.mxu0 %v4010_v14 }
 0x247   :  { %3386 = vmatprep.subr.bf16.mxu0 %v3890_v0 }
 0x24a   :  { %3388 = vmatpush3.bf16.msra.mxu0 %v4019_v18 }
 0x24b   :  { %3389 = vmatprep.subr.bf16.mxu0 %v3890_v0 }
 0x24e   :  { %3391 = vmatpush3.bf16.msra.mxu0 %v4025_v21 }
 0x24f   :  { %3392 = vmatprep.subr.bf16.mxu0 %v3890_v0 }
 0x252   :  { %3394 = vmatpush3.bf16.msra.mxu0 %v4031_v24 }
 0x253   :  { %3395 = vmatprep.subr.bf16.mxu0 %v3890_v0 }
 0x256   :  { %3397 = vmatpush3.bf16.msra.mxu0 %v4037_v27 }
 0x257   :  { %3398 = vmatprep.subr.bf16.mxu0 %v3890_v0 }
 0x2f2   :  { %v628_v42 = vpop.f32.mrb[4].mxu1 }
 0x2f3   :  { %v633_v44 = vrot.slane %v628_v42, 6  ;;  %v2562_v45 = vpop.f32.mrb[5].mxu1 }
 0x2f5   :  { %v635_v47 = vadd.f32 %v633_v44, %v4117_v22 }
 0x2f7   :  { %3765 = vtanh.f32 %v635_v47 }
 0x301   :  { %v3766_v48 = vpop.eup %3765 }
 0x302   :  { %781 = vst [vmem:[#allocation10] sm:$0x4] %v3766_v48  ;;  %v708_v50 = vrot.slane %v3766_v48, 2 }
 0x304   :  { %2666 = vmatmul.mubr.f32.vlgmr.msra.gmra.mrb[4].mxu0 %v708_v50 }
 0x305   :  { %3400 = vmatpush3.bf16.msra.mxu0 %v4043_v31  ;;  %2700 = vmatprep.mubr.msk.f32.mxu0 %vm3891_vm0, %v3892_v1 }
 0x306   :  { %3401 = vmatprep.subr.bf16.mxu0 %v3890_v0 }
 0x309   :  { %3403 = vmatpush3.bf16.msra.mxu0 %v4049_v34 }
 0x30a   :  { %3404 = vmatprep.subr.bf16.mxu0 %v3890_v0 }
 0x30c   :  { %v555_v51 = vpop.f32.mrb[2].mxu0 }
 0x30d   :  { %3767 = vtanh.f32 %v555_v51  ;;  %v2527_v53 = vpop.f32.mrb[3].mxu0  ;;  %3406 = vmatpush3.bf16.msra.mxu0 %v4055_v37 }
 0x30e   :  { %3407 = vmatprep.subr.bf16.mxu0 %v3890_v0 }
 0x311   :  { %3409 = vmatpush3.bf16.msra.mxu0 %v4059_v40 }
 0x312   :  { %3410 = vmatprep.subr.bf16.mxu0 %v3890_v0 }
 0x315   :  { %3412 = vmatpush3.bf16.msra.mxu0 %v4063_v43 }
 0x316   :  { %3413 = vmatprep.subr.bf16.mxu0 %v3890_v0 }
 0x317   :  { %v3768_v54 = vpop.eup %3767 }
 0x318   :  { %561 = vst [vmem:[%s4528_s7 + $0x1] sm:$0x1] %v3768_v54  ;;  %2596 = vmatmul.mubr.f32.vlgmr.msra.gmra.mrb[6].mxu1 %v3768_v54 }
 0x319   :  { %3352 = vmatpush3.bf16.msra.mxu1 %v4079_v56  ;;  %2630 = vmatprep.mubr.msk.f32.mxu1 %vm3891_vm0, %v3892_v1 }
 0x31a   :  { %3353 = vmatprep.subr.bf16.mxu1 %v3890_v0  ;;  %3415 = vmatpush3.bf16.msra.mxu0 %v4067_v46 }
 0x31b   :  { %3416 = vmatprep.subr.bf16.mxu0 %v3890_v0 }
 0x31d   :  { %3355 = vmatpush3.bf16.msra.mxu1 %v4083_v59 }
 0x31e   :  { %3356 = vmatprep.subr.bf16.mxu1 %v3890_v0  ;;  %3418 = vmatpush3.bf16.msra.mxu0 %v4071_v49 }
 0x31f   :  { %3419 = vmatprep.subr.bf16.mxu0 %v3890_v0 }
 0x321   :  { %3358 = vmatpush3.bf16.msra.mxu1 %v4089_v62 }
 0x322   :  { %3359 = vmatprep.subr.bf16.mxu1 %v3890_v0  ;;  %3421 = vmatpush3.bf16.msra.mxu0 %v4075_v52 }
 0x323   :  { %3422 = vmatprep.subr.bf16.mxu0 %v3890_v0 }
 0x325   :  { %3361 = vmatpush3.bf16.msra.mxu1 %v4093_v3 }
 0x326   :  { %3362 = vmatprep.subr.bf16.mxu1 %v3890_v0 }
 0x329   :  { %3364 = vmatpush3.bf16.msra.mxu1 %v4097_v8 }
 0x32a   :  { %3365 = vmatprep.subr.bf16.mxu1 %v3890_v0 }
 0x32d   :  { %3367 = vmatpush3.bf16.msra.mxu1 %v4102_v12 }
 0x32e   :  { %3368 = vmatprep.subr.bf16.mxu1 %v3890_v0 }
 0x331   :  { %3370 = vmatpush3.bf16.msra.mxu1 %v4106_v16 }
 0x332   :  { %3371 = vmatprep.subr.bf16.mxu1 %v3890_v0 }
 0x335   :  { %3373 = vmatpush3.bf16.msra.mxu1 %v4110_v20 }
 0x336   :  { %3446 = vmatprep.subr.bf16.mxu1 %v3890_v0 }
 0x338   :  { %2631 = vmatmul.mubr.f32.vlgmr.msra.gmra.mrb[6].mxu1 %v708_v50 }
 0x339   :  { %3448 = vmatpush3.bf16.msra.mxu1 %v3992_v5  ;;  %2770 = vmatprep.mubr.msk.f32.mxu1 %vm3891_vm0, %v3892_v1 }
 0x33a   :  { %3449 = vmatprep.subr.bf16.mxu1 %v3890_v0 }
 0x33d   :  { %3451 = vmatpush3.bf16.msra.mxu1 %v3995_v7 }
 0x33e   :  { %3452 = vmatprep.subr.bf16.mxu1 %v3890_v0 }
 0x341   :  { %3454 = vmatpush3.bf16.msra.mxu1 %v4004_v11 }
 0x342   :  { %3455 = vmatprep.subr.bf16.mxu1 %v3890_v0 }
 0x345   :  { %3457 = vmatpush3.bf16.msra.mxu1 %v4010_v14 }
 0x346   :  { %3458 = vmatprep.subr.bf16.mxu1 %v3890_v0 }
 0x349   :  { %3460 = vmatpush3.bf16.msra.mxu1 %v4019_v18 }
 0x34a   :  { %3461 = vmatprep.subr.bf16.mxu1 %v3890_v0 }
 0x34d   :  { %3463 = vmatpush3.bf16.msra.mxu1 %v4025_v21 }
 0x34e   :  { %3464 = vmatprep.subr.bf16.mxu1 %v3890_v0 }
 0x351   :  { %3466 = vmatpush3.bf16.msra.mxu1 %v4031_v24 }
 0x352   :  { %3467 = vmatprep.subr.bf16.mxu1 %v3890_v0 }
 0x355   :  { %3469 = vmatpush3.bf16.msra.mxu1 %v4037_v27 }
 0x356   :  { %3470 = vmatprep.subr.bf16.mxu1 %v3890_v0 }
 0x3d7   :  { %v849_v55 = vpop.f32.mrb[4].mxu0 }
 0x3d8   :  { %v854_v57 = vrot.slane %v849_v55, 5  ;;  %v2667_v58 = vpop.f32.mrb[5].mxu0 }
 0x3da   :  { %v856_v60 = vadd.f32 %v854_v57, %v4117_v22 }
 0x3dc   :  { %3769 = vtanh.f32 %v856_v60 }
 0x3e6   :  { %v3770_v61 = vpop.eup %3769 }
 0x3e7   :  { %1002 = vst [vmem:[#allocation10] sm:$0x8] %v3770_v61  ;;  %v929_v63 = vrot.slane %v3770_v61, 3 }
 0x3e9   :  { %2771 = vmatmul.mubr.f32.vlgmr.msra.gmra.mrb[8].mxu1 %v929_v63 }
 0x3ea   :  { %3472 = vmatpush3.bf16.msra.mxu1 %v4043_v31  ;;  %2805 = vmatprep.mubr.msk.f32.mxu1 %vm3891_vm0, %v3892_v1 }
 0x3eb   :  { %3473 = vmatprep.subr.bf16.mxu1 %v3890_v0 }
 0x3ee   :  { %3475 = vmatpush3.bf16.msra.mxu1 %v4049_v34 }
 0x3ef   :  { %3476 = vmatprep.subr.bf16.mxu1 %v3890_v0 }
 0x3f2   :  { %3478 = vmatpush3.bf16.msra.mxu1 %v4055_v37 }
 0x3f3   :  { %3479 = vmatprep.subr.bf16.mxu1 %v3890_v0 }
 0x3f6   :  { %3481 = vmatpush3.bf16.msra.mxu1 %v4059_v40 }
 0x3f7   :  { %3482 = vmatprep.subr.bf16.mxu1 %v3890_v0 }
 0x3fa   :  { %3484 = vmatpush3.bf16.msra.mxu1 %v4063_v43 }
 0x3fb   :  { %3485 = vmatprep.subr.bf16.mxu1 %v3890_v0 }
 0x3fe   :  { %3487 = vmatpush3.bf16.msra.mxu1 %v4067_v46 }
 0x3ff   :  { %3488 = vmatprep.subr.bf16.mxu1 %v3890_v0 }
 0x402   :  { %3490 = vmatpush3.bf16.msra.mxu1 %v4071_v49 }
 0x403   :  { %3491 = vmatprep.subr.bf16.mxu1 %v3890_v0 }
 0x406   :  { %3493 = vmatpush3.bf16.msra.mxu1 %v4075_v52 }
 0x407   :  { %3494 = vmatprep.subr.bf16.mxu1 %v3890_v0 }
 0x40b   :  { %v776_v2 = vpop.f32.mrb[6].mxu1 }
 0x40c   :  { %3771 = vtanh.f32 %v776_v2  ;;  %v2632_v4 = vpop.f32.mrb[7].mxu1 }
 0x416   :  { %v3772_v6 = vpop.eup %3771 }
 0x417   :  { %782 = vst [vmem:[%s4528_s7 + $0x2] sm:$0x1] %v3772_v6  ;;  %2701 = vmatmul.mubr.f32.vlgmr.msra.gmra.mrb[6].mxu0 %v3772_v6 }
 0x418   :  { %3424 = vmatpush3.bf16.msra.mxu0 %v4079_v56  ;;  %2735 = vmatprep.mubr.msk.f32.mxu0 %vm3891_vm0, %v3892_v1 }
 0x419   :  { %3425 = vmatprep.subr.bf16.mxu0 %v3890_v0 }
 0x41c   :  { %3427 = vmatpush3.bf16.msra.mxu0 %v4083_v59 }
 0x41d   :  { %3428 = vmatprep.subr.bf16.mxu0 %v3890_v0 }
 0x420   :  { %3430 = vmatpush3.bf16.msra.mxu0 %v4089_v62 }
 0x421   :  { %3431 = vmatprep.subr.bf16.mxu0 %v3890_v0 }
 0x424   :  { %3433 = vmatpush3.bf16.msra.mxu0 %v4093_v3 }
 0x425   :  { %3434 = vmatprep.subr.bf16.mxu0 %v3890_v0 }
 0x428   :  { %3436 = vmatpush3.bf16.msra.mxu0 %v4097_v8 }
 0x429   :  { %3437 = vmatprep.subr.bf16.mxu0 %v3890_v0 }
 0x42c   :  { %3439 = vmatpush3.bf16.msra.mxu0 %v4102_v12 }
 0x42d   :  { %3440 = vmatprep.subr.bf16.mxu0 %v3890_v0 }
 0x430   :  { %3442 = vmatpush3.bf16.msra.mxu0 %v4106_v16 }
 0x431   :  { %3443 = vmatprep.subr.bf16.mxu0 %v3890_v0 }
 0x434   :  { %3445 = vmatpush3.bf16.msra.mxu0 %v4110_v20 }
 0x435   :  { %3518 = vmatprep.subr.bf16.mxu0 %v3890_v0 }
 0x437   :  { %2736 = vmatmul.mubr.f32.vlgmr.msra.gmra.mrb[6].mxu0 %v929_v63 }
 0x438   :  { %3520 = vmatpush3.bf16.msra.mxu0 %v3992_v5  ;;  %2875 = vmatprep.mubr.msk.f32.mxu0 %vm3891_vm0, %v3892_v1 }
 0x439   :  { %3521 = vmatprep.subr.bf16.mxu0 %v3890_v0 }
 0x43c   :  { %3523 = vmatpush3.bf16.msra.mxu0 %v3995_v7 }
 0x43d   :  { %3524 = vmatprep.subr.bf16.mxu0 %v3890_v0 }
 0x440   :  { %3526 = vmatpush3.bf16.msra.mxu0 %v4004_v11 }
 0x441   :  { %3527 = vmatprep.subr.bf16.mxu0 %v3890_v0 }
 0x444   :  { %3529 = vmatpush3.bf16.msra.mxu0 %v4010_v14 }
 0x445   :  { %3530 = vmatprep.subr.bf16.mxu0 %v3890_v0 }
 0x448   :  { %3532 = vmatpush3.bf16.msra.mxu0 %v4019_v18 }
 0x449   :  { %3533 = vmatprep.subr.bf16.mxu0 %v3890_v0 }
 0x44c   :  { %3535 = vmatpush3.bf16.msra.mxu0 %v4025_v21 }
 0x44d   :  { %3536 = vmatprep.subr.bf16.mxu0 %v3890_v0 }
 0x450   :  { %3538 = vmatpush3.bf16.msra.mxu0 %v4031_v24 }
 0x451   :  { %3539 = vmatprep.subr.bf16.mxu0 %v3890_v0 }
 0x454   :  { %3541 = vmatpush3.bf16.msra.mxu0 %v4037_v27 }
 0x455   :  { %3542 = vmatprep.subr.bf16.mxu0 %v3890_v0 }
 0x4bc   :  { %v1070_v9 = vpop.f32.mrb[8].mxu1 }
 0x4bd   :  { %v1075_v10 = vrot.slane %v1070_v9, 4  ;;  %v2772_v13 = vpop.f32.mrb[9].mxu1 }
 0x4bf   :  { %v1077_v15 = vadd.f32 %v1075_v10, %v4117_v22 }
 0x4c1   :  { %3773 = vtanh.f32 %v1077_v15 }
 0x4cb   :  { %v3774_v17 = vpop.eup %3773 }
 0x4cc   :  { %1223 = vst [vmem:[#allocation10] sm:$0x10] %v3774_v17  ;;  %v1150_v19 = vrot.slane %v3774_v17, 4 }
 0x4ce   :  { %2876 = vmatmul.mubr.f32.vlgmr.msra.gmra.mrb[8].mxu0 %v1150_v19 }
 0x4cf   :  { %3544 = vmatpush3.bf16.msra.mxu0 %v4043_v31  ;;  %2910 = vmatprep.mubr.msk.f32.mxu0 %vm3891_vm0, %v3892_v1 }
 0x4d0   :  { %3545 = vmatprep.subr.bf16.mxu0 %v3890_v0 }
 0x4d3   :  { %3547 = vmatpush3.bf16.msra.mxu0 %v4049_v34 }
 0x4d4   :  { %3548 = vmatprep.subr.bf16.mxu0 %v3890_v0 }
 0x4d7   :  { %3550 = vmatpush3.bf16.msra.mxu0 %v4055_v37 }
 0x4d8   :  { %3551 = vmatprep.subr.bf16.mxu0 %v3890_v0 }
 0x4db   :  { %3553 = vmatpush3.bf16.msra.mxu0 %v4059_v40 }
 0x4dc   :  { %3554 = vmatprep.subr.bf16.mxu0 %v3890_v0 }
 0x4df   :  { %3556 = vmatpush3.bf16.msra.mxu0 %v4063_v43 }
 0x4e0   :  { %3557 = vmatprep.subr.bf16.mxu0 %v3890_v0 }
 0x4e3   :  { %3559 = vmatpush3.bf16.msra.mxu0 %v4067_v46 }
 0x4e4   :  { %3560 = vmatprep.subr.bf16.mxu0 %v3890_v0 }
 0x4e7   :  { %3562 = vmatpush3.bf16.msra.mxu0 %v4071_v49 }
 0x4e8   :  { %3563 = vmatprep.subr.bf16.mxu0 %v3890_v0 }
 0x4eb   :  { %3565 = vmatpush3.bf16.msra.mxu0 %v4075_v52 }
 0x4ec   :  { %3566 = vmatprep.subr.bf16.mxu0 %v3890_v0 }
 0x50a   :  { %v997_v23 = vpop.f32.mrb[6].mxu0 }
 0x50b   :  { %3775 = vtanh.f32 %v997_v23  ;;  %v2737_v25 = vpop.f32.mrb[7].mxu0 }
 0x515   :  { %v3776_v26 = vpop.eup %3775 }
 0x516   :  { %1003 = vst [vmem:[%s4528_s7 + $0x3] sm:$0x1] %v3776_v26  ;;  %2806 = vmatmul.mubr.f32.vlgmr.msra.gmra.mrb[10].mxu1 %v3776_v26 }
 0x517   :  { %3496 = vmatpush3.bf16.msra.mxu1 %v4079_v56  ;;  %2840 = vmatprep.mubr.msk.f32.mxu1 %vm3891_vm0, %v3892_v1 }
 0x518   :  { %3497 = vmatprep.subr.bf16.mxu1 %v3890_v0 }
 0x51b   :  { %3499 = vmatpush3.bf16.msra.mxu1 %v4083_v59 }
 0x51c   :  { %3500 = vmatprep.subr.bf16.mxu1 %v3890_v0 }
 0x51f   :  { %3502 = vmatpush3.bf16.msra.mxu1 %v4089_v62 }
 0x520   :  { %3503 = vmatprep.subr.bf16.mxu1 %v3890_v0 }
 0x523   :  { %3505 = vmatpush3.bf16.msra.mxu1 %v4093_v3 }
 0x524   :  { %3506 = vmatprep.subr.bf16.mxu1 %v3890_v0 }
 0x527   :  { %3508 = vmatpush3.bf16.msra.mxu1 %v4097_v8 }
 0x528   :  { %3509 = vmatprep.subr.bf16.mxu1 %v3890_v0 }
 0x52b   :  { %3511 = vmatpush3.bf16.msra.mxu1 %v4102_v12 }
 0x52c   :  { %3512 = vmatprep.subr.bf16.mxu1 %v3890_v0 }
 0x52f   :  { %3514 = vmatpush3.bf16.msra.mxu1 %v4106_v16 }
 0x530   :  { %3515 = vmatprep.subr.bf16.mxu1 %v3890_v0 }
 0x533   :  { %3517 = vmatpush3.bf16.msra.mxu1 %v4110_v20 }
 0x534   :  { %3590 = vmatprep.subr.bf16.mxu1 %v3890_v0 }
 0x536   :  { %2841 = vmatmul.mubr.f32.vlgmr.msra.gmra.mrb[10].mxu1 %v1150_v19 }
 0x537   :  { %3592 = vmatpush3.bf16.msra.mxu1 %v3992_v5  ;;  %2980 = vmatprep.mubr.msk.f32.mxu1 %vm3891_vm0, %v3892_v1 }
 0x538   :  { %3593 = vmatprep.subr.bf16.mxu1 %v3890_v0 }
 0x53b   :  { %3595 = vmatpush3.bf16.msra.mxu1 %v3995_v7 }
 0x53c   :  { %3596 = vmatprep.subr.bf16.mxu1 %v3890_v0 }
 0x53f   :  { %3598 = vmatpush3.bf16.msra.mxu1 %v4004_v11 }
 0x540   :  { %3599 = vmatprep.subr.bf16.mxu1 %v3890_v0 }
 0x543   :  { %3601 = vmatpush3.bf16.msra.mxu1 %v4010_v14 }
 0x544   :  { %3602 = vmatprep.subr.bf16.mxu1 %v3890_v0 }
 0x547   :  { %3604 = vmatpush3.bf16.msra.mxu1 %v4019_v18 }
 0x548   :  { %3605 = vmatprep.subr.bf16.mxu1 %v3890_v0 }
 0x54b   :  { %3607 = vmatpush3.bf16.msra.mxu1 %v4025_v21 }
 0x54c   :  { %3608 = vmatprep.subr.bf16.mxu1 %v3890_v0 }
 0x54f   :  { %3610 = vmatpush3.bf16.msra.mxu1 %v4031_v24 }
 0x550   :  { %3611 = vmatprep.subr.bf16.mxu1 %v3890_v0 }
 0x553   :  { %3613 = vmatpush3.bf16.msra.mxu1 %v4037_v27 }
 0x554   :  { %3614 = vmatprep.subr.bf16.mxu1 %v3890_v0 }
 0x5a1   :  { %v1291_v28 = vpop.f32.mrb[8].mxu0 }
 0x5a2   :  { %v1296_v29 = vrot.slane %v1291_v28, 3  ;;  %v2877_v30 = vpop.f32.mrb[9].mxu0 }
 0x5a4   :  { %v1298_v32 = vadd.f32 %v1296_v29, %v4117_v22 }
 0x5a6   :  { %3777 = vtanh.f32 %v1298_v32 }
 0x5b0   :  { %v3778_v33 = vpop.eup %3777 }
 0x5b1   :  { %1444 = vst [vmem:[#allocation10] sm:$0x20] %v3778_v33  ;;  %v1371_v35 = vrot.slane %v3778_v33, 5 }
 0x5b3   :  { %2981 = vmatmul.mubr.f32.vlgmr.msra.gmra.mrb[12].mxu1 %v1371_v35 }
 0x5b4   :  { %3616 = vmatpush3.bf16.msra.mxu1 %v4043_v31  ;;  %3015 = vmatprep.mubr.msk.f32.mxu1 %vm3891_vm0, %v3892_v1 }
 0x5b5   :  { %3617 = vmatprep.subr.bf16.mxu1 %v3890_v0 }
 0x5b8   :  { %3619 = vmatpush3.bf16.msra.mxu1 %v4049_v34 }
 0x5b9   :  { %3620 = vmatprep.subr.bf16.mxu1 %v3890_v0 }
 0x5bc   :  { %3622 = vmatpush3.bf16.msra.mxu1 %v4055_v37 }
 0x5bd   :  { %3623 = vmatprep.subr.bf16.mxu1 %v3890_v0 }
 0x5c0   :  { %3625 = vmatpush3.bf16.msra.mxu1 %v4059_v40 }
 0x5c1   :  { %3626 = vmatprep.subr.bf16.mxu1 %v3890_v0 }
 0x5c4   :  { %3628 = vmatpush3.bf16.msra.mxu1 %v4063_v43 }
 0x5c5   :  { %3629 = vmatprep.subr.bf16.mxu1 %v3890_v0 }
 0x5c8   :  { %3631 = vmatpush3.bf16.msra.mxu1 %v4067_v46 }
 0x5c9   :  { %3632 = vmatprep.subr.bf16.mxu1 %v3890_v0 }
 0x5cc   :  { %3634 = vmatpush3.bf16.msra.mxu1 %v4071_v49 }
 0x5cd   :  { %3635 = vmatprep.subr.bf16.mxu1 %v3890_v0 }
 0x5d0   :  { %3637 = vmatpush3.bf16.msra.mxu1 %v4075_v52 }
 0x5d1   :  { %3638 = vmatprep.subr.bf16.mxu1 %v3890_v0 }
 0x609   :  { %v1218_v36 = vpop.f32.mrb[10].mxu1 }
 0x60a   :  { %3779 = vtanh.f32 %v1218_v36  ;;  %v2842_v38 = vpop.f32.mrb[11].mxu1 }
 0x614   :  { %v3780_v39 = vpop.eup %3779 }
 0x615   :  { %1224 = vst [vmem:[%s4528_s7 + $0x4] sm:$0x1] %v3780_v39  ;;  %2911 = vmatmul.mubr.f32.vlgmr.msra.gmra.mrb[10].mxu0 %v3780_v39 }
 0x616   :  { %3568 = vmatpush3.bf16.msra.mxu0 %v4079_v56  ;;  %2945 = vmatprep.mubr.msk.f32.mxu0 %vm3891_vm0, %v3892_v1 }
 0x617   :  { %3569 = vmatprep.subr.bf16.mxu0 %v3890_v0 }
 0x61a   :  { %3571 = vmatpush3.bf16.msra.mxu0 %v4083_v59 }
 0x61b   :  { %3572 = vmatprep.subr.bf16.mxu0 %v3890_v0 }
 0x61e   :  { %3574 = vmatpush3.bf16.msra.mxu0 %v4089_v62 }
 0x61f   :  { %3575 = vmatprep.subr.bf16.mxu0 %v3890_v0 }
 0x622   :  { %3577 = vmatpush3.bf16.msra.mxu0 %v4093_v3 }
 0x623   :  { %3578 = vmatprep.subr.bf16.mxu0 %v3890_v0 }
 0x626   :  { %3580 = vmatpush3.bf16.msra.mxu0 %v4097_v8 }
 0x627   :  { %3581 = vmatprep.subr.bf16.mxu0 %v3890_v0 }
 0x62a   :  { %3583 = vmatpush3.bf16.msra.mxu0 %v4102_v12 }
 0x62b   :  { %3584 = vmatprep.subr.bf16.mxu0 %v3890_v0 }
 0x62e   :  { %3586 = vmatpush3.bf16.msra.mxu0 %v4106_v16 }
 0x62f   :  { %3587 = vmatprep.subr.bf16.mxu0 %v3890_v0 }
 0x632   :  { %3589 = vmatpush3.bf16.msra.mxu0 %v4110_v20 }
 0x633   :  { %3662 = vmatprep.subr.bf16.mxu0 %v3890_v0 }
 0x635   :  { %2946 = vmatmul.mubr.f32.vlgmr.msra.gmra.mrb[10].mxu0 %v1371_v35 }
 0x636   :  { %3664 = vmatpush3.bf16.msra.mxu0 %v3992_v5  ;;  %3085 = vmatprep.mubr.msk.f32.mxu0 %vm3891_vm0, %v3892_v1 }
 0x637   :  { %3665 = vmatprep.subr.bf16.mxu0 %v3890_v0 }
 0x63a   :  { %3667 = vmatpush3.bf16.msra.mxu0 %v3995_v7 }
 0x63b   :  { %3668 = vmatprep.subr.bf16.mxu0 %v3890_v0 }
 0x63e   :  { %3670 = vmatpush3.bf16.msra.mxu0 %v4004_v11 }
 0x63f   :  { %3671 = vmatprep.subr.bf16.mxu0 %v3890_v0 }
 0x642   :  { %3673 = vmatpush3.bf16.msra.mxu0 %v4010_v14 }
 0x643   :  { %3674 = vmatprep.subr.bf16.mxu0 %v3890_v0 }
 0x646   :  { %3676 = vmatpush3.bf16.msra.mxu0 %v4019_v18 }
 0x647   :  { %3677 = vmatprep.subr.bf16.mxu0 %v3890_v0 }
 0x64a   :  { %3679 = vmatpush3.bf16.msra.mxu0 %v4025_v21 }
 0x64b   :  { %3680 = vmatprep.subr.bf16.mxu0 %v3890_v0 }
 0x64e   :  { %3682 = vmatpush3.bf16.msra.mxu0 %v4031_v24 }
 0x64f   :  { %3683 = vmatprep.subr.bf16.mxu0 %v3890_v0 }
 0x652   :  { %3685 = vmatpush3.bf16.msra.mxu0 %v4037_v27 }
 0x653   :  { %3686 = vmatprep.subr.bf16.mxu0 %v3890_v0 }
 0x686   :  { %v1512_v5 = vpop.f32.mrb[12].mxu1 }
 0x687   :  { %v1517_v7 = vrot.slane %v1512_v5, 2  ;;  %v2982_v11 = vpop.f32.mrb[13].mxu1 }
 0x689   :  { %v1519_v14 = vadd.f32 %v1517_v7, %v4117_v22 }
 0x68b   :  { %3781 = vtanh.f32 %v1519_v14 }
 0x695   :  { %v3782_v18 = vpop.eup %3781 }
 0x696   :  { %1665 = vst [vmem:[#allocation10] sm:$0x40] %v3782_v18  ;;  %v1592_v41 = vrot.slane %v3782_v18, 6 }
 0x698   :  { %3086 = vmatmul.mubr.f32.vlgmr.msra.gmra.mrb[12].mxu0 %v1592_v41 }
 0x699   :  { %3688 = vmatpush3.bf16.msra.mxu0 %v4043_v31  ;;  %3120 = vmatprep.mubr.msk.f32.mxu0 %vm3891_vm0, %v3892_v1 }
 0x69a   :  { %3689 = vmatprep.subr.bf16.mxu0 %v3890_v0 }
 0x69d   :  { %3691 = vmatpush3.bf16.msra.mxu0 %v4049_v34 }
 0x69e   :  { %3692 = vmatprep.subr.bf16.mxu0 %v3890_v0 }
 0x6a1   :  { %3694 = vmatpush3.bf16.msra.mxu0 %v4055_v37 }
 0x6a2   :  { %3695 = vmatprep.subr.bf16.mxu0 %v3890_v0 }
 0x6a5   :  { %3697 = vmatpush3.bf16.msra.mxu0 %v4059_v40 }
 0x6a6   :  { %3698 = vmatprep.subr.bf16.mxu0 %v3890_v0 }
 0x6a9   :  { %3700 = vmatpush3.bf16.msra.mxu0 %v4063_v43 }
 0x6aa   :  { %3701 = vmatprep.subr.bf16.mxu0 %v3890_v0 }
 0x6ad   :  { %3703 = vmatpush3.bf16.msra.mxu0 %v4067_v46 }
 0x6ae   :  { %3704 = vmatprep.subr.bf16.mxu0 %v3890_v0 }
 0x6b1   :  { %3706 = vmatpush3.bf16.msra.mxu0 %v4071_v49 }
 0x6b2   :  { %3707 = vmatprep.subr.bf16.mxu0 %v3890_v0 }
 0x6b5   :  { %3709 = vmatpush3.bf16.msra.mxu0 %v4075_v52 }
 0x6b6   :  { %3710 = vmatprep.subr.bf16.mxu0 %v3890_v0 }
 0x708   :  { %v1439_v21 = vpop.f32.mrb[10].mxu0 }
 0x709   :  { %3783 = vtanh.f32 %v1439_v21  ;;  %v2947_v24 = vpop.f32.mrb[11].mxu0 }
 0x713   :  { %v3784_v27 = vpop.eup %3783 }
 0x714   :  { %1445 = vst [vmem:[%s4528_s7 + $0x5] sm:$0x1] %v3784_v27  ;;  %3016 = vmatmul.mubr.f32.vlgmr.msra.gmra.mrb[14].mxu1 %v3784_v27 }
 0x715   :  { %3640 = vmatpush3.bf16.msra.mxu1 %v4079_v56  ;;  %3050 = vmatprep.mubr.msk.f32.mxu1 %vm3891_vm0, %v3892_v1 }
 0x716   :  { %3641 = vmatprep.subr.bf16.mxu1 %v3890_v0 }
 0x719   :  { %3643 = vmatpush3.bf16.msra.mxu1 %v4083_v59 }
 0x71a   :  { %3644 = vmatprep.subr.bf16.mxu1 %v3890_v0 }
 0x71d   :  { %3646 = vmatpush3.bf16.msra.mxu1 %v4089_v62 }
 0x71e   :  { %3647 = vmatprep.subr.bf16.mxu1 %v3890_v0 }
 0x721   :  { %3649 = vmatpush3.bf16.msra.mxu1 %v4093_v3 }
 0x722   :  { %3650 = vmatprep.subr.bf16.mxu1 %v3890_v0 }
 0x725   :  { %3652 = vmatpush3.bf16.msra.mxu1 %v4097_v8 }
 0x726   :  { %3653 = vmatprep.subr.bf16.mxu1 %v3890_v0 }
 0x729   :  { %3655 = vmatpush3.bf16.msra.mxu1 %v4102_v12 }
 0x72a   :  { %3656 = vmatprep.subr.bf16.mxu1 %v3890_v0 }
 0x72d   :  { %3658 = vmatpush3.bf16.msra.mxu1 %v4106_v16 }
 0x72e   :  { %3659 = vmatprep.subr.bf16.mxu1 %v3890_v0 }
 0x731   :  { %3661 = vmatpush3.bf16.msra.mxu1 %v4110_v20 }
 0x734   :  { %3051 = vmatmul.mubr.f32.vlgmr.msra.gmra.mrb[14].mxu1 %v1592_v41 }
 0x76b   :  { %v1733_v31 = vpop.f32.mrb[12].mxu0 }
 0x76c   :  { %v1738_v34 = vrot.slane %v1733_v31, 1  ;;  %v3087_v37 = vpop.f32.mrb[13].mxu0 }
 0x76e   :  { %v1740_v40 = vadd.f32 %v1738_v34, %v4117_v22 }
 0x770   :  { %3785 = vtanh.f32 %v1740_v40 }
 0x77a   :  { %v3786_v43 = vpop.eup %3785 }
 0x77b   :  { %1888 = vst [vmem:[#allocation2 - $0x7] sm:$0x80] %v3786_v43  ;;  %1886 = vst [vmem:[#allocation10] sm:$0x80] %v3786_v43 }
 0x807   :  { %v1660_v46 = vpop.f32.mrb[14].mxu1 }
 0x808   :  { %3787 = vtanh.f32 %v1660_v46  ;;  %v3052_v49 = vpop.f32.mrb[15].mxu1 }
 0x812   :  { %v3788_v52 = vpop.eup %3787 }
 0x813   :  { %1666 = vst [vmem:[%s4528_s7 + $0x6] sm:$0x1] %v3788_v52  ;;  %3121 = vmatmul.mubr.f32.vlgmr.msra.gmra.mrb[14].mxu0 %v3788_v52 }
 0x814   :  { %3712 = vmatpush3.bf16.msra.mxu0 %v4079_v56  ;;  %3155 = vmatprep.mubr.msk.f32.mxu0 %vm3891_vm0, %v3892_v1  ;;  %v1813_v1 = vrot.slane %v3786_v43, 7 }
 0x815   :  { %3713 = vmatprep.subr.bf16.mxu0 %v3890_v0 }
 0x818   :  { %3715 = vmatpush3.bf16.msra.mxu0 %v4083_v59 }
 0x819   :  { %3716 = vmatprep.subr.bf16.mxu0 %v3890_v0 }
 0x81c   :  { %3718 = vmatpush3.bf16.msra.mxu0 %v4089_v62 }
 0x81d   :  { %3719 = vmatprep.subr.bf16.mxu0 %v3890_v0 }
 0x820   :  { %3721 = vmatpush3.bf16.msra.mxu0 %v4093_v3 }
 0x821   :  { %3722 = vmatprep.subr.bf16.mxu0 %v3890_v0 }
 0x824   :  { %3724 = vmatpush3.bf16.msra.mxu0 %v4097_v8 }
 0x825   :  { %3725 = vmatprep.subr.bf16.mxu0 %v3890_v0 }
 0x828   :  { %3727 = vmatpush3.bf16.msra.mxu0 %v4102_v12 }
 0x829   :  { %3728 = vmatprep.subr.bf16.mxu0 %v3890_v0 }
 0x82c   :  { %3730 = vmatpush3.bf16.msra.mxu0 %v4106_v16 }
 0x82d   :  { %3731 = vmatprep.subr.bf16.mxu0 %v3890_v0 }
 0x830   :  { %3733 = vmatpush3.bf16.msra.mxu0 %v4110_v20 }
 0x833   :  { %3156 = vmatmul.mubr.f32.vlgmr.msra.gmra.mrb[14].mxu0 %v1813_v1 }
 0x834   :  { %3868 = shalt.err (!%p3865_p0)
}
 0x835   :  { %s3869_s12 = scalar_lea.hbm %s4527_s6, 128 }
 0x836   :  { %p3870_p1 = scmp.ne.s32.totalorder %s4527_s6, %s3869_s12  ;;  %p3873_p2 = scmp.lt.u32.totalorder %s3869_s12, %s4527_s6 }
 0x838   :  { %p3875_p3 = pnand %p3873_p2, %p3870_p1 }
 0x83a   :  { %3878 = shalt.err (!%p3875_p3)
}
 0x83b   :  { %1899 = dma.vmem_to_hbm [thread:$0]  %s1897_s8, 128, %s4527_s6, [#allocation6]  }
 0x906   :  { %v1881_v0 = vpop.f32.mrb[14].mxu0 }
 0x907   :  { %3789 = vtanh.f32 %v1881_v0  ;;  %v3157_v56 = vpop.f32.mrb[15].mxu0 }
 0x911   :  { %v3790_v59 = vpop.eup %3789 }
 0x912   :  { %1887 = vst [vmem:[%s4528_s7 + $0x7] sm:$0x1] %v3790_v59  ;;  %1889 = vst [vmem:[#allocation3] sm:$0x1] %v3790_v59 }
 0x913   :  { %3883 = dma.done.wait [#allocation6], 128  }
 0x914   :  { %3884 = vsyncadd [#allocation6], 4294967168 }
 0x915   :  { %1907 = vsyncpa [#allocation5], 1 }
 0x916   :  { %1908 = vsyncpa [#allocation8], 1 }
 0x917   :  { %1909 = vsyncpa [#allocation6], 1 }

</bundles_post_ra>
